<compile_context>
chip_gen: v7x
topology: tpu7x:2x2x1
jax: 0.10.0
libtpu: 0.0.40
codegen_flags: <defaults>
</compile_context>

<pallas_src>
import functools
import math

import jax
import jax.numpy as jnp
from jax.experimental import pallas as pl
from jax.experimental.pallas import tpu as pltpu


# --------------------------------------------------------------------------- #
# helpers
# --------------------------------------------------------------------------- #
def _layer_norm(v, g, b, eps=1e-5):
    v = v.astype(jnp.float32)
    mu = jnp.mean(v, axis=-1, keepdims=True)
    var = jnp.mean(jnp.square(v - mu), axis=-1, keepdims=True)
    return (v - mu) * jax.lax.rsqrt(var + eps) * g.astype(jnp.float32) + b.astype(
        jnp.float32
    )


def _pick_tile(total, pref, align):
    """Largest common tile <= pref that keeps Mosaic's tiling constraints."""
    t = math.gcd(int(total), int(pref))
    if t % align != 0 and t != total:
        t = total
    return t


def _raw_bytes(itemsize, *shapes):
    return sum(int(math.prod(s)) * int(itemsize) for s in shapes)


def _vmem_limit(raw_bytes):
    # 2x headroom for (8,128) padding / double-buffering slack; generous floor
    # (well under any chip's physical VMEM), cap below 128 MiB.
    return int(min(max(2 * raw_bytes + (8 << 20), 32 << 20), 112 << 20))


# --------------------------------------------------------------------------- #
# kernel A: LN1 + fused QKV projection, head-major outputs
# --------------------------------------------------------------------------- #
def ln_qkv_kernel(x_ref, ln1g_ref, ln1b_ref, wqkv_ref, bqkv_ref,
                  q_ref, k_ref, v_ref, *, num_heads):
    x = x_ref[0]                      # (TT, D)
    _, D = x.shape
    dh = D // num_heads

    ln1 = _layer_norm(x, ln1g_ref[0], ln1b_ref[0])
    qkv = jnp.dot(ln1.astype(wqkv_ref.dtype), wqkv_ref[...],
                  preferred_element_type=jnp.float32) + bqkv_ref[0]
    qkv = qkv.astype(q_ref.dtype)     # (TT, 3D)

    # Write each head's slice directly into the head-major outputs (no concat,
    # no in-kernel transpose later in the attention kernel).
    for h in range(num_heads):
        q_ref[0, h] = qkv[:, h * dh:(h + 1) * dh]
        k_ref[0, h] = qkv[:, D + h * dh:D + (h + 1) * dh]
        v_ref[0, h] = qkv[:, 2 * D + h * dh:2 * D + (h + 1) * dh]


# --------------------------------------------------------------------------- #
# kernel B: flash attention over KV tiles (online softmax), heads batched
# --------------------------------------------------------------------------- #
def flash_attn_kernel(q_ref, k_ref, v_ref, o_ref, m_sc, l_sc, acc_sc):
    ki = pl.program_id(2)

    @pl.when(ki == 0)
    def _():
        m_sc[...] = jnp.full(m_sc.shape, -jnp.inf, jnp.float32)
        l_sc[...] = jnp.zeros(l_sc.shape, jnp.float32)
        acc_sc[...] = jnp.zeros(acc_sc.shape, jnp.float32)

    q = q_ref[0].astype(jnp.float32)          # (H, TQ, dh)
    k = k_ref[0]                              # (H, TK, dh)
    v = v_ref[0]                              # (H, TK, dh)
    scale = 1.0 / math.sqrt(q.shape[-1])
    q = (q * scale).astype(k.dtype)           # fold 1/sqrt(dh) into Q (H*TQ*dh muls)

    # Batched over heads (leading batch dim) -> no kh.T, no per-head loop.
    s = jnp.einsum("hqd,hkd->hqk", q, k, preferred_element_type=jnp.float32)

    m_prev = m_sc[...]
    m_new = jnp.maximum(m_prev, jnp.max(s, axis=-1, keepdims=True))
    alpha = jnp.exp(m_prev - m_new)
    p = jnp.exp(s - m_new)                    # unnormalized probs (no per-elem divide)

    l_sc[...] = alpha * l_sc[...] + jnp.sum(p, axis=-1, keepdims=True)
    acc_sc[...] = alpha * acc_sc[...] + jnp.einsum(
        "hqk,hkd->hqd", p.astype(v.dtype), v, preferred_element_type=jnp.float32)
    m_sc[...] = m_new

    @pl.when(ki == pl.num_programs(2) - 1)
    def _():
        # One reciprocal per (head, query row); exact keeps the 1e-4 tolerance.
        # (approx=True is a free EUP op if a looser tolerance is acceptable.)
        inv_l = pl.reciprocal(l_sc[...], approx=False)
        o_ref[0] = (acc_sc[...] * inv_l).astype(o_ref.dtype)


# --------------------------------------------------------------------------- #
# kernel C: residual + LN2 + FFN (d_ff streamed as a reduction grid axis)
# --------------------------------------------------------------------------- #
def ffn_kernel(x_ref, ctx_ref, ln2g_ref, ln2b_ref, w1_ref, b1_ref, w2_ref, b2_ref,
               o_ref, y_sc, ln2_sc, acc_sc, *, num_heads):
    fi = pl.program_id(2)

    @pl.when(fi == 0)
    def _():
        x = x_ref[0].astype(jnp.float32)      # (TT, D)
        _, D = x.shape
        dh = D // num_heads
        # Reassemble head-major attention context into a (TT, D) scratch slab.
        for h in range(num_heads):
            y_sc[:, h * dh:(h + 1) * dh] = ctx_ref[0, h].astype(jnp.float32)
        y = y_sc[...] + x                     # residual 1
        y_sc[...] = y
        ln2_sc[...] = _layer_norm(y, ln2g_ref[0], ln2b_ref[0])
        acc_sc[...] = jnp.zeros(acc_sc.shape, jnp.float32)

    # Partial FFN over this d_ff tile: relu(ln2 @ W1_f + b1_f) @ W2_f, accumulate.
    hdn = jnp.dot(ln2_sc[...].astype(w1_ref.dtype), w1_ref[...],
                  preferred_element_type=jnp.float32) + b1_ref[0]
    hdn = jnp.maximum(hdn, 0.0)
    acc_sc[...] += jnp.dot(hdn.astype(w2_ref.dtype), w2_ref[...],
                           preferred_element_type=jnp.float32)

    @pl.when(fi == pl.num_programs(2) - 1)
    def _():
        o_ref[0] = (acc_sc[...] + b2_ref[0] + y_sc[...]).astype(o_ref.dtype)


# --------------------------------------------------------------------------- #
# wrapper
# --------------------------------------------------------------------------- #
@functools.partial(jax.jit, static_argnames=("num_heads",))
def transformer_lm_layer(x, params, num_heads):
    B, T, D = x.shape
    assert D % num_heads == 0
    dh = D // num_heads
    F = params["w1"].shape[1]
    dt = x.dtype
    fsz = jnp.dtype(dt).itemsize

    tt = _pick_tile(T, 256, 8)      # row tile for projection / FFN kernels
    tq = _pick_tile(T, 256, 8)      # query tile
    tk = _pick_tile(T, 256, 8)      # key/value tile
    tf = _pick_tile(F, 512, 128)    # d_ff tile (streamed weight columns)

    # Fuse the three projection weights -> one (D, 3D) MXU matmul per row tile.
    wqkv = jnp.concatenate([params["wq"], params["wk"], params["wv"]], axis=1)
    bqkv = jnp.concatenate([params["bq"], params["bk"], params["bv"]], axis=1)

    # ---------------- kernel A: LN1 + QKV projection -> (B, H, T, dh) -------- #
    a_raw = 2 * _raw_bytes(fsz, (tt, D)) + 6 * _raw_bytes(fsz, (num_heads, tt, dh)) \
        + 2 * _raw_bytes(fsz, (D, 3 * D), (1, 3 * D), (1, D), (1, D))
    hm_shape = jax.ShapeDtypeStruct((B, num_heads, T, dh), dt)
    q_hm, k_hm, v_hm = pl.pallas_call(
        functools.partial(ln_qkv_kernel, num_heads=num_heads),
        out_shape=(hm_shape, hm_shape, hm_shape),
        grid=(B, T // tt),
        in_specs=[
            pl.BlockSpec((1, tt, D), lambda b, t: (b, t, 0)),
            pl.BlockSpec((1, D), lambda b, t: (0, 0)),
            pl.BlockSpec((1, D), lambda b, t: (0, 0)),
            pl.BlockSpec((D, 3 * D), lambda b, t: (0, 0)),
            pl.BlockSpec((1, 3 * D), lambda b, t: (0, 0)),
        ],
        out_specs=(
            pl.BlockSpec((1, num_heads, tt, dh), lambda b, t: (b, 0, t, 0)),
            pl.BlockSpec((1, num_heads, tt, dh), lambda b, t: (b, 0, t, 0)),
            pl.BlockSpec((1, num_heads, tt, dh), lambda b, t: (b, 0, t, 0)),
        ),
        compiler_params=pltpu.CompilerParams(
            dimension_semantics=("parallel", "parallel"),
            vmem_limit_bytes=_vmem_limit(a_raw),
        ),
        cost_estimate=pl.CostEstimate(
            flops=2 * B * T * D * 3 * D,
            transcendentals=B * T,
            bytes_accessed=4 * B * T * D * fsz + (3 * D * D + 6 * D) * fsz,
        ),
    )(x, params["ln1_g"], params["ln1_b"], wqkv, bqkv)

    # ---------------- kernel B: flash attention ------------------------------ #
    n_q, n_k = T // tq, T // tk
    b_raw = 4 * _raw_bytes(fsz, (num_heads, tq, dh)) \
        + 4 * _raw_bytes(fsz, (num_heads, tk, dh)) \
        + _raw_bytes(4, (num_heads, tq, 1), (num_heads, tq, 1), (num_heads, tq, dh))
    ctx_hm = pl.pallas_call(
        flash_attn_kernel,
        out_shape=jax.ShapeDtypeStruct((B, num_heads, T, dh), dt),
        grid=(B, n_q, n_k),
        in_specs=[
            pl.BlockSpec((1, num_heads, tq, dh), lambda b, qi, ki: (b, 0, qi, 0)),
            pl.BlockSpec((1, num_heads, tk, dh), lambda b, qi, ki: (b, 0, ki, 0)),
            pl.BlockSpec((1, num_heads, tk, dh), lambda b, qi, ki: (b, 0, ki, 0)),
        ],
        out_specs=pl.BlockSpec((1, num_heads, tq, dh),
                               lambda b, qi, ki: (b, 0, qi, 0)),
        scratch_shapes=[
            pltpu.VMEM((num_heads, tq, 1), jnp.float32),   # running max
            pltpu.VMEM((num_heads, tq, 1), jnp.float32),   # running sum
            pltpu.VMEM((num_heads, tq, dh), jnp.float32),  # context accumulator
        ],
        compiler_params=pltpu.CompilerParams(
            dimension_semantics=("parallel", "parallel", "arbitrary"),
            vmem_limit_bytes=_vmem_limit(b_raw),
        ),
        cost_estimate=pl.CostEstimate(
            flops=4 * B * num_heads * T * T * dh,
            transcendentals=B * num_heads * T * T,
            bytes_accessed=(2 + 2 * n_q) * B * num_heads * T * dh * fsz,
        ),
    )(q_hm, k_hm, v_hm)

    # ---------------- kernel C: residual + LN2 + FFN + residual -------------- #
    n_f = F // tf
    c_raw = 2 * _raw_bytes(fsz, (tt, D), (num_heads, tt, dh), (tt, D)) \
        + 2 * _raw_bytes(fsz, (D, tf), (1, tf), (tf, D), (1, D), (1, D), (1, D)) \
        + 3 * _raw_bytes(4, (tt, D))
    out = pl.pallas_call(
        functools.partial(ffn_kernel, num_heads=num_heads),
        out_shape=jax.ShapeDtypeStruct((B, T, D), dt),
        grid=(B, T // tt, n_f),
        in_specs=[
            pl.BlockSpec((1, tt, D), lambda b, t, f: (b, t, 0)),
            pl.BlockSpec((1, num_heads, tt, dh), lambda b, t, f: (b, 0, t, 0)),
            pl.BlockSpec((1, D), lambda b, t, f: (0, 0)),
            pl.BlockSpec((1, D), lambda b, t, f: (0, 0)),
            pl.BlockSpec((D, tf), lambda b, t, f: (0, f)),
            pl.BlockSpec((1, tf), lambda b, t, f: (0, f)),
            pl.BlockSpec((tf, D), lambda b, t, f: (f, 0)),
            pl.BlockSpec((1, D), lambda b, t, f: (0, 0)),
        ],
        out_specs=pl.BlockSpec((1, tt, D), lambda b, t, f: (b, t, 0)),
        scratch_shapes=[
            pltpu.VMEM((tt, D), jnp.float32),   # y (residual-1 result)
            pltpu.VMEM((tt, D), jnp.float32),   # ln2(y)
            pltpu.VMEM((tt, D), jnp.float32),   # FFN accumulator
        ],
        compiler_params=pltpu.CompilerParams(
            dimension_semantics=("parallel", "parallel", "arbitrary"),
            vmem_limit_bytes=_vmem_limit(c_raw),
        ),
        cost_estimate=pl.CostEstimate(
            flops=4 * B * T * D * F,
            transcendentals=B * T,
            bytes_accessed=3 * B * T * D * fsz + 2 * D * F * fsz,
        ),
    )(x, ctx_hm, params["ln2_g"], params["ln2_b"],
      params["w1"], params["b1"], params["w2"], params["b2"])

    return out


# --------------------------------------------------------------------------- #
# pure-JAX reference mirroring the PyTorch forward (eval mode)
# --------------------------------------------------------------------------- #
def reference(x, params, num_heads):
    B, T, D = x.shape
    dh = D // num_heads

    def ln(v, g, b):
        mu = jnp.mean(v, axis=-1, keepdims=True)
        var = jnp.mean((v - mu) ** 2, axis=-1, keepdims=True)
        return (v - mu) / jnp.sqrt(var + 1e-5) * g + b

    ln1 = ln(x, params["ln1_g"][0], params["ln1_b"][0])
    q = ln1 @ params["wq"] + params["bq"][0]
    k = ln1 @ params["wk"] + params["bk"][0]
    v = ln1 @ params["wv"] + params["bv"][0]
    qh = q.reshape(B, T, num_heads, dh)
    kh = k.reshape(B, T, num_heads, dh)
    vh = v.reshape(B, T, num_heads, dh)
    s = jnp.einsum("bthd,bshd->bhts", qh, kh) / jnp.sqrt(jnp.float32(dh))
    a = jax.nn.softmax(s, axis=-1)
    ctx = jnp.einsum("bhts,bshd->bthd", a, vh).reshape(B, T, D)
    y = ctx + x
    ln2 = ln(y, params["ln2_g"][0], params["ln2_b"][0])
    h = jnp.maximum(ln2 @ params["w1"] + params["b1"][0], 0.0)
    ff = h @ params["w2"] + params["b2"][0]
    return ff + y


if __name__ == "__main__":
    # Small shapes consistent with the module: d_model divisible by num_heads.
    B, T, D, H, F = 2, 8, 32, 4, 64

    key = jax.random.PRNGKey(0)
    ks = jax.random.split(key, 16)

    def nrm(k, shape, scale=0.1):
        return (scale * jax.random.normal(k, shape)).astype(jnp.float32)

    params = {
        "ln1_g": (1.0 + nrm(ks[0], (1, D))),
        "ln1_b": nrm(ks[1], (1, D)),
        "wq": nrm(ks[2], (D, D)), "bq": nrm(ks[3], (1, D)),
        "wk": nrm(ks[4], (D, D)), "bk": nrm(ks[5], (1, D)),
        "wv": nrm(ks[6], (D, D)), "bv": nrm(ks[7], (1, D)),
        "ln2_g": (1.0 + nrm(ks[8], (1, D))),
        "ln2_b": nrm(ks[9], (1, D)),
        "w1": nrm(ks[10], (D, F)), "b1": nrm(ks[11], (1, F)),
        "w2": nrm(ks[12], (F, D)), "b2": nrm(ks[13], (1, D)),
    }
    x = nrm(ks[14], (B, T, D), scale=1.0)

    out = transformer_lm_layer(x, params, num_heads=H)
    out = jax.block_until_ready(out)

    ref = reference(x, params, num_heads=H)
    assert out.shape == (B, T, D)
    err = jnp.max(jnp.abs(out - ref))
    assert jnp.allclose(out, ref, atol=2e-4, rtol=2e-4), f"max abs err {err}"
    print("KERNEL_OK")
</pallas_src>

<mosaic_0001>
module attributes {stable_mosaic.version = 11 : i64} {
  func.func @ln_qkv_kernel(%arg0: i32, %arg1: i32, %arg2: memref<1x8x32xf32, #tpu.memory_space<vmem>>, %arg3: memref<1x32xf32, #tpu.memory_space<vmem>>, %arg4: memref<1x32xf32, #tpu.memory_space<vmem>>, %arg5: memref<32x96xf32, #tpu.memory_space<vmem>>, %arg6: memref<1x96xf32, #tpu.memory_space<vmem>>, %arg7: memref<1x4x8x8xf32, #tpu.memory_space<vmem>>, %arg8: memref<1x4x8x8xf32, #tpu.memory_space<vmem>>, %arg9: memref<1x4x8x8xf32, #tpu.memory_space<vmem>>) attributes {dimension_semantics = [#tpu.dimension_semantics<parallel>, #tpu.dimension_semantics<parallel>], iteration_bounds = array<i64: 2, 1>, scalar_prefetch = 0 : i64, scratch_operands = 0 : i64, tpu.core_type = #tpu.core_type<tc>, window_params = [{transform_indices = @transform_0, window_bounds = array<i64: 1, 8, 32>}, {pipeline_mode = #tpu.pipeline_mode<synchronous>, transform_indices = @transform_1, window_bounds = array<i64: 1, 32>}, {pipeline_mode = #tpu.pipeline_mode<synchronous>, transform_indices = @transform_2, window_bounds = array<i64: 1, 32>}, {pipeline_mode = #tpu.pipeline_mode<synchronous>, transform_indices = @transform_3, window_bounds = array<i64: 32, 96>}, {pipeline_mode = #tpu.pipeline_mode<synchronous>, transform_indices = @transform_4, window_bounds = array<i64: 1, 96>}, {transform_indices = @transform_5, window_bounds = array<i64: 1, 4, 8, 8>}, {transform_indices = @transform_6, window_bounds = array<i64: 1, 4, 8, 8>}, {transform_indices = @transform_7, window_bounds = array<i64: 1, 4, 8, 8>}]} {
    %c0 = arith.constant 0 : index
    %c0_0 = arith.constant 0 : index
    %c0_1 = arith.constant 0 : index
    %0 = vector.load %arg2[%c0, %c0_0, %c0_1] : memref<1x8x32xf32, #tpu.memory_space<vmem>>, vector<1x8x32xf32>
    %1 = vector.shape_cast %0 : vector<1x8x32xf32> to vector<8x32xf32>
    %c0_2 = arith.constant 0 : index
    %c0_3 = arith.constant 0 : index
    %2 = vector.load %arg3[%c0_2, %c0_3] : memref<1x32xf32, #tpu.memory_space<vmem>>, vector<1x32xf32>
    %3 = vector.shape_cast %2 : vector<1x32xf32> to vector<32xf32>
    %c0_4 = arith.constant 0 : index
    %c0_5 = arith.constant 0 : index
    %4 = vector.load %arg4[%c0_4, %c0_5] : memref<1x32xf32, #tpu.memory_space<vmem>>, vector<1x32xf32>
    %5 = vector.shape_cast %4 : vector<1x32xf32> to vector<32xf32>
    %cst = arith.constant dense<0.000000e+00> : vector<8xf32>
    %6 = vector.multi_reduction <add>, %1, %cst [1] : vector<8x32xf32> to vector<8xf32>
    %7 = vector.shape_cast %6 : vector<8xf32> to vector<8x1xf32>
    %cst_6 = arith.constant 3.200000e+01 : f32
    %8 = vector.broadcast %cst_6 : f32 to vector<8x1xf32>
    %9 = arith.divf %7, %8 : vector<8x1xf32>
    %10 = vector.broadcast %9 : vector<8x1xf32> to vector<8x32xf32>
    %11 = arith.subf %1, %10 : vector<8x32xf32>
    %12 = arith.mulf %11, %11 : vector<8x32xf32>
    %cst_7 = arith.constant dense<0.000000e+00> : vector<8xf32>
    %13 = vector.multi_reduction <add>, %12, %cst_7 [1] : vector<8x32xf32> to vector<8xf32>
    %14 = vector.shape_cast %13 : vector<8xf32> to vector<8x1xf32>
    %cst_8 = arith.constant 3.200000e+01 : f32
    %15 = vector.broadcast %cst_8 : f32 to vector<8x1xf32>
    %16 = arith.divf %14, %15 : vector<8x1xf32>
    %17 = vector.broadcast %9 : vector<8x1xf32> to vector<8x32xf32>
    %18 = arith.subf %1, %17 : vector<8x32xf32>
    %cst_9 = arith.constant 9.99999974E-6 : f32
    %19 = vector.broadcast %cst_9 : f32 to vector<8x1xf32>
    %20 = arith.addf %16, %19 : vector<8x1xf32>
    %21 = math.rsqrt %20 : vector<8x1xf32>
    %22 = vector.broadcast %21 : vector<8x1xf32> to vector<8x32xf32>
    %23 = arith.mulf %18, %22 : vector<8x32xf32>
    %24 = vector.shape_cast %3 : vector<32xf32> to vector<1x32xf32>
    %25 = vector.broadcast %24 : vector<1x32xf32> to vector<8x32xf32>
    %26 = arith.mulf %23, %25 : vector<8x32xf32>
    %27 = vector.shape_cast %5 : vector<32xf32> to vector<1x32xf32>
    %28 = vector.broadcast %27 : vector<1x32xf32> to vector<8x32xf32>
    %29 = arith.addf %26, %28 : vector<8x32xf32>
    %c0_10 = arith.constant 0 : index
    %c0_11 = arith.constant 0 : index
    %30 = vector.load %arg5[%c0_10, %c0_11] : memref<32x96xf32, #tpu.memory_space<vmem>>, vector<32x96xf32>
    %cst_12 = arith.constant dense<0.000000e+00> : vector<8x96xf32>
    %31 = tpu.matmul %29, %30, %cst_12 {dimension_numbers = #tpu.dot_dimension_numbers<[1], [0], [0], [1], [0, 0, 1, 1], [], []>} : vector<8x32xf32>, vector<32x96xf32>, vector<8x96xf32> -> vector<8x96xf32>
    %c0_13 = arith.constant 0 : index
    %c0_14 = arith.constant 0 : index
    %32 = vector.load %arg6[%c0_13, %c0_14] : memref<1x96xf32, #tpu.memory_space<vmem>>, vector<1x96xf32>
    %33 = vector.shape_cast %32 : vector<1x96xf32> to vector<96xf32>
    %34 = vector.shape_cast %33 : vector<96xf32> to vector<1x96xf32>
    %35 = vector.broadcast %34 : vector<1x96xf32> to vector<8x96xf32>
    %36 = arith.addf %31, %35 : vector<8x96xf32>
    %37 = vector.extract_strided_slice %36 {offsets = [0, 0], sizes = [8, 8], strides = [1, 1]} : vector<8x96xf32> to vector<8x8xf32>
    %c0_15 = arith.constant 0 : index
    %c0_16 = arith.constant 0 : index
    %c0_17 = arith.constant 0 : index
    %c0_18 = arith.constant 0 : index
    %38 = vector.load %arg7[%c0_15, %c0_16, %c0_17, %c0_18] : memref<1x4x8x8xf32, #tpu.memory_space<vmem>>, vector<1x1x8x8xf32>
    %39 = vector.shape_cast %38 : vector<1x1x8x8xf32> to vector<8x8xf32>
    %40 = vector.shape_cast %37 : vector<8x8xf32> to vector<1x1x8x8xf32>
    tpu.vector_store %arg7[%c0_15, %c0_16, %c0_17, %c0_18], %40 {strides = array<i32>} : memref<1x4x8x8xf32, #tpu.memory_space<vmem>>, vector<1x1x8x8xf32>,
    %41 = vector.extract_strided_slice %36 {offsets = [0, 32], sizes = [8, 8], strides = [1, 1]} : vector<8x96xf32> to vector<8x8xf32>
    %c0_19 = arith.constant 0 : index
    %c0_20 = arith.constant 0 : index
    %c0_21 = arith.constant 0 : index
    %c0_22 = arith.constant 0 : index
    %42 = vector.load %arg8[%c0_19, %c0_20, %c0_21, %c0_22] : memref<1x4x8x8xf32, #tpu.memory_space<vmem>>, vector<1x1x8x8xf32>
    %43 = vector.shape_cast %42 : vector<1x1x8x8xf32> to vector<8x8xf32>
    %44 = vector.shape_cast %41 : vector<8x8xf32> to vector<1x1x8x8xf32>
    tpu.vector_store %arg8[%c0_19, %c0_20, %c0_21, %c0_22], %44 {strides = array<i32>} : memref<1x4x8x8xf32, #tpu.memory_space<vmem>>, vector<1x1x8x8xf32>,
    %45 = vector.extract_strided_slice %36 {offsets = [0, 64], sizes = [8, 8], strides = [1, 1]} : vector<8x96xf32> to vector<8x8xf32>
    %c0_23 = arith.constant 0 : index
    %c0_24 = arith.constant 0 : index
    %c0_25 = arith.constant 0 : index
    %c0_26 = arith.constant 0 : index
    %46 = vector.load %arg9[%c0_23, %c0_24, %c0_25, %c0_26] : memref<1x4x8x8xf32, #tpu.memory_space<vmem>>, vector<1x1x8x8xf32>
    %47 = vector.shape_cast %46 : vector<1x1x8x8xf32> to vector<8x8xf32>
    %48 = vector.shape_cast %45 : vector<8x8xf32> to vector<1x1x8x8xf32>
    tpu.vector_store %arg9[%c0_23, %c0_24, %c0_25, %c0_26], %48 {strides = array<i32>} : memref<1x4x8x8xf32, #tpu.memory_space<vmem>>, vector<1x1x8x8xf32>,
    %49 = vector.extract_strided_slice %36 {offsets = [0, 8], sizes = [8, 8], strides = [1, 1]} : vector<8x96xf32> to vector<8x8xf32>
    %c0_27 = arith.constant 0 : index
    %c1 = arith.constant 1 : index
    %c0_28 = arith.constant 0 : index
    %c0_29 = arith.constant 0 : index
    %50 = vector.load %arg7[%c0_27, %c1, %c0_28, %c0_29] : memref<1x4x8x8xf32, #tpu.memory_space<vmem>>, vector<1x1x8x8xf32>
    %51 = vector.shape_cast %50 : vector<1x1x8x8xf32> to vector<8x8xf32>
    %52 = vector.shape_cast %49 : vector<8x8xf32> to vector<1x1x8x8xf32>
    tpu.vector_store %arg7[%c0_27, %c1, %c0_28, %c0_29], %52 {strides = array<i32>} : memref<1x4x8x8xf32, #tpu.memory_space<vmem>>, vector<1x1x8x8xf32>,
    %53 = vector.extract_strided_slice %36 {offsets = [0, 40], sizes = [8, 8], strides = [1, 1]} : vector<8x96xf32> to vector<8x8xf32>
    %c0_30 = arith.constant 0 : index
    %c1_31 = arith.constant 1 : index
    %c0_32 = arith.constant 0 : index
    %c0_33 = arith.constant 0 : index
    %54 = vector.load %arg8[%c0_30, %c1_31, %c0_32, %c0_33] : memref<1x4x8x8xf32, #tpu.memory_space<vmem>>, vector<1x1x8x8xf32>
    %55 = vector.shape_cast %54 : vector<1x1x8x8xf32> to vector<8x8xf32>
    %56 = vector.shape_cast %53 : vector<8x8xf32> to vector<1x1x8x8xf32>
    tpu.vector_store %arg8[%c0_30, %c1_31, %c0_32, %c0_33], %56 {strides = array<i32>} : memref<1x4x8x8xf32, #tpu.memory_space<vmem>>, vector<1x1x8x8xf32>,
    %57 = vector.extract_strided_slice %36 {offsets = [0, 72], sizes = [8, 8], strides = [1, 1]} : vector<8x96xf32> to vector<8x8xf32>
    %c0_34 = arith.constant 0 : index
    %c1_35 = arith.constant 1 : index
    %c0_36 = arith.constant 0 : index
    %c0_37 = arith.constant 0 : index
    %58 = vector.load %arg9[%c0_34, %c1_35, %c0_36, %c0_37] : memref<1x4x8x8xf32, #tpu.memory_space<vmem>>, vector<1x1x8x8xf32>
    %59 = vector.shape_cast %58 : vector<1x1x8x8xf32> to vector<8x8xf32>
    %60 = vector.shape_cast %57 : vector<8x8xf32> to vector<1x1x8x8xf32>
    tpu.vector_store %arg9[%c0_34, %c1_35, %c0_36, %c0_37], %60 {strides = array<i32>} : memref<1x4x8x8xf32, #tpu.memory_space<vmem>>, vector<1x1x8x8xf32>,
    %61 = vector.extract_strided_slice %36 {offsets = [0, 16], sizes = [8, 8], strides = [1, 1]} : vector<8x96xf32> to vector<8x8xf32>
    %c0_38 = arith.constant 0 : index
    %c2 = arith.constant 2 : index
    %c0_39 = arith.constant 0 : index
    %c0_40 = arith.constant 0 : index
    %62 = vector.load %arg7[%c0_38, %c2, %c0_39, %c0_40] : memref<1x4x8x8xf32, #tpu.memory_space<vmem>>, vector<1x1x8x8xf32>
    %63 = vector.shape_cast %62 : vector<1x1x8x8xf32> to vector<8x8xf32>
    %64 = vector.shape_cast %61 : vector<8x8xf32> to vector<1x1x8x8xf32>
    tpu.vector_store %arg7[%c0_38, %c2, %c0_39, %c0_40], %64 {strides = array<i32>} : memref<1x4x8x8xf32, #tpu.memory_space<vmem>>, vector<1x1x8x8xf32>,
    %65 = vector.extract_strided_slice %36 {offsets = [0, 48], sizes = [8, 8], strides = [1, 1]} : vector<8x96xf32> to vector<8x8xf32>
    %c0_41 = arith.constant 0 : index
    %c2_42 = arith.constant 2 : index
    %c0_43 = arith.constant 0 : index
    %c0_44 = arith.constant 0 : index
    %66 = vector.load %arg8[%c0_41, %c2_42, %c0_43, %c0_44] : memref<1x4x8x8xf32, #tpu.memory_space<vmem>>, vector<1x1x8x8xf32>
    %67 = vector.shape_cast %66 : vector<1x1x8x8xf32> to vector<8x8xf32>
    %68 = vector.shape_cast %65 : vector<8x8xf32> to vector<1x1x8x8xf32>
    tpu.vector_store %arg8[%c0_41, %c2_42, %c0_43, %c0_44], %68 {strides = array<i32>} : memref<1x4x8x8xf32, #tpu.memory_space<vmem>>, vector<1x1x8x8xf32>,
    %69 = vector.extract_strided_slice %36 {offsets = [0, 80], sizes = [8, 8], strides = [1, 1]} : vector<8x96xf32> to vector<8x8xf32>
    %c0_45 = arith.constant 0 : index
    %c2_46 = arith.constant 2 : index
    %c0_47 = arith.constant 0 : index
    %c0_48 = arith.constant 0 : index
    %70 = vector.load %arg9[%c0_45, %c2_46, %c0_47, %c0_48] : memref<1x4x8x8xf32, #tpu.memory_space<vmem>>, vector<1x1x8x8xf32>
    %71 = vector.shape_cast %70 : vector<1x1x8x8xf32> to vector<8x8xf32>
    %72 = vector.shape_cast %69 : vector<8x8xf32> to vector<1x1x8x8xf32>
    tpu.vector_store %arg9[%c0_45, %c2_46, %c0_47, %c0_48], %72 {strides = array<i32>} : memref<1x4x8x8xf32, #tpu.memory_space<vmem>>, vector<1x1x8x8xf32>,
    %73 = vector.extract_strided_slice %36 {offsets = [0, 24], sizes = [8, 8], strides = [1, 1]} : vector<8x96xf32> to vector<8x8xf32>
    %c0_49 = arith.constant 0 : index
    %c3 = arith.constant 3 : index
    %c0_50 = arith.constant 0 : index
    %c0_51 = arith.constant 0 : index
    %74 = vector.load %arg7[%c0_49, %c3, %c0_50, %c0_51] : memref<1x4x8x8xf32, #tpu.memory_space<vmem>>, vector<1x1x8x8xf32>
    %75 = vector.shape_cast %74 : vector<1x1x8x8xf32> to vector<8x8xf32>
    %76 = vector.shape_cast %73 : vector<8x8xf32> to vector<1x1x8x8xf32>
    tpu.vector_store %arg7[%c0_49, %c3, %c0_50, %c0_51], %76 {strides = array<i32>} : memref<1x4x8x8xf32, #tpu.memory_space<vmem>>, vector<1x1x8x8xf32>,
    %77 = vector.extract_strided_slice %36 {offsets = [0, 56], sizes = [8, 8], strides = [1, 1]} : vector<8x96xf32> to vector<8x8xf32>
    %c0_52 = arith.constant 0 : index
    %c3_53 = arith.constant 3 : index
    %c0_54 = arith.constant 0 : index
    %c0_55 = arith.constant 0 : index
    %78 = vector.load %arg8[%c0_52, %c3_53, %c0_54, %c0_55] : memref<1x4x8x8xf32, #tpu.memory_space<vmem>>, vector<1x1x8x8xf32>
    %79 = vector.shape_cast %78 : vector<1x1x8x8xf32> to vector<8x8xf32>
    %80 = vector.shape_cast %77 : vector<8x8xf32> to vector<1x1x8x8xf32>
    tpu.vector_store %arg8[%c0_52, %c3_53, %c0_54, %c0_55], %80 {strides = array<i32>} : memref<1x4x8x8xf32, #tpu.memory_space<vmem>>, vector<1x1x8x8xf32>,
    %81 = vector.extract_strided_slice %36 {offsets = [0, 88], sizes = [8, 8], strides = [1, 1]} : vector<8x96xf32> to vector<8x8xf32>
    %c0_56 = arith.constant 0 : index
    %c3_57 = arith.constant 3 : index
    %c0_58 = arith.constant 0 : index
    %c0_59 = arith.constant 0 : index
    %82 = vector.load %arg9[%c0_56, %c3_57, %c0_58, %c0_59] : memref<1x4x8x8xf32, #tpu.memory_space<vmem>>, vector<1x1x8x8xf32>
    %83 = vector.shape_cast %82 : vector<1x1x8x8xf32> to vector<8x8xf32>
    %84 = vector.shape_cast %81 : vector<8x8xf32> to vector<1x1x8x8xf32>
    tpu.vector_store %arg9[%c0_56, %c3_57, %c0_58, %c0_59], %84 {strides = array<i32>} : memref<1x4x8x8xf32, #tpu.memory_space<vmem>>, vector<1x1x8x8xf32>,
    return
  }
  func.func @transform_0(%arg0: i32, %arg1: i32) -> (i32, i32, i32) {
    %c0_i32 = arith.constant 0 : i32
    %c0_i32_0 = arith.constant 0 : i32
    return %arg0, %arg1, %c0_i32 : i32, i32, i32
  }
  func.func @transform_1(%arg0: i32, %arg1: i32) -> (i32, i32) {
    %c0_i32 = arith.constant 0 : i32
    %c0_i32_0 = arith.constant 0 : i32
    %c0_i32_1 = arith.constant 0 : i32
    return %c0_i32, %c0_i32_0 : i32, i32
  }
  func.func @transform_2(%arg0: i32, %arg1: i32) -> (i32, i32) {
    %c0_i32 = arith.constant 0 : i32
    %c0_i32_0 = arith.constant 0 : i32
    %c0_i32_1 = arith.constant 0 : i32
    return %c0_i32, %c0_i32_0 : i32, i32
  }
  func.func @transform_3(%arg0: i32, %arg1: i32) -> (i32, i32) {
    %c0_i32 = arith.constant 0 : i32
    %c0_i32_0 = arith.constant 0 : i32
    %c0_i32_1 = arith.constant 0 : i32
    return %c0_i32, %c0_i32_0 : i32, i32
  }
  func.func @transform_4(%arg0: i32, %arg1: i32) -> (i32, i32) {
    %c0_i32 = arith.constant 0 : i32
    %c0_i32_0 = arith.constant 0 : i32
    %c0_i32_1 = arith.constant 0 : i32
    return %c0_i32, %c0_i32_0 : i32, i32
  }
  func.func @transform_5(%arg0: i32, %arg1: i32) -> (i32, i32, i32, i32) {
    %c0_i32 = arith.constant 0 : i32
    %c0_i32_0 = arith.constant 0 : i32
    %c0_i32_1 = arith.constant 0 : i32
    return %arg0, %c0_i32, %arg1, %c0_i32_0 : i32, i32, i32, i32
  }
  func.func @transform_6(%arg0: i32, %arg1: i32) -> (i32, i32, i32, i32) {
    %c0_i32 = arith.constant 0 : i32
    %c0_i32_0 = arith.constant 0 : i32
    %c0_i32_1 = arith.constant 0 : i32
    return %arg0, %c0_i32, %arg1, %c0_i32_0 : i32, i32, i32, i32
  }
  func.func @transform_7(%arg0: i32, %arg1: i32) -> (i32, i32, i32, i32) {
    %c0_i32 = arith.constant 0 : i32
    %c0_i32_0 = arith.constant 0 : i32
    %c0_i32_1 = arith.constant 0 : i32
    return %arg0, %c0_i32, %arg1, %c0_i32_0 : i32, i32, i32, i32
  }
}

module attributes {stable_mosaic.version = 11 : i64} {
  func.func @flash_attn_kernel(%arg0: i32, %arg1: i32, %arg2: i32, %arg3: memref<1x4x8x8xf32, #tpu.memory_space<vmem>>, %arg4: memref<1x4x8x8xf32, #tpu.memory_space<vmem>>, %arg5: memref<1x4x8x8xf32, #tpu.memory_space<vmem>>, %arg6: memref<1x4x8x8xf32, #tpu.memory_space<vmem>>, %arg7: memref<4x8x1xf32, #tpu.memory_space<vmem>>, %arg8: memref<4x8x1xf32, #tpu.memory_space<vmem>>, %arg9: memref<4x8x8xf32, #tpu.memory_space<vmem>>) attributes {dimension_semantics = [#tpu.dimension_semantics<parallel>, #tpu.dimension_semantics<parallel>, #tpu.dimension_semantics<arbitrary>], iteration_bounds = array<i64: 2, 1, 1>, scalar_prefetch = 0 : i64, scratch_operands = 3 : i64, tpu.core_type = #tpu.core_type<tc>, window_params = [{transform_indices = @transform_0, window_bounds = array<i64: 1, 4, 8, 8>}, {transform_indices = @transform_1, window_bounds = array<i64: 1, 4, 8, 8>}, {transform_indices = @transform_2, window_bounds = array<i64: 1, 4, 8, 8>}, {transform_indices = @transform_3, window_bounds = array<i64: 1, 4, 8, 8>}]} {
    %c0_i32 = arith.constant 0 : i32
    %0 = arith.cmpi eq, %arg2, %c0_i32 : i32
    %1 = arith.extui %0 : i1 to i32
    %c0_i32_0 = arith.constant 0 : i32
    %2 = arith.cmpi ne, %1, %c0_i32_0 : i32
    scf.if %2 {
      %cst_36 = arith.constant 0xFF800000 : f32
      %37 = vector.broadcast %cst_36 : f32 to vector<4x8x1xf32>
      %c0_37 = arith.constant 0 : index
      %c0_38 = arith.constant 0 : index
      %c0_39 = arith.constant 0 : index
      %38 = vector.load %arg7[%c0_37, %c0_38, %c0_39] : memref<4x8x1xf32, #tpu.memory_space<vmem>>, vector<4x8x1xf32>
      tpu.vector_store %arg7[%c0_37, %c0_38, %c0_39], %37 {strides = array<i32>} : memref<4x8x1xf32, #tpu.memory_space<vmem>>, vector<4x8x1xf32>,
      %cst_40 = arith.constant 0.000000e+00 : f32
      %39 = vector.broadcast %cst_40 : f32 to vector<4x8x1xf32>
      %c0_41 = arith.constant 0 : index
      %c0_42 = arith.constant 0 : index
      %c0_43 = arith.constant 0 : index
      %40 = vector.load %arg8[%c0_41, %c0_42, %c0_43] : memref<4x8x1xf32, #tpu.memory_space<vmem>>, vector<4x8x1xf32>
      tpu.vector_store %arg8[%c0_41, %c0_42, %c0_43], %39 {strides = array<i32>} : memref<4x8x1xf32, #tpu.memory_space<vmem>>, vector<4x8x1xf32>,
      %cst_44 = arith.constant 0.000000e+00 : f32
      %41 = vector.broadcast %cst_44 : f32 to vector<4x8x8xf32>
      %c0_45 = arith.constant 0 : index
      %c0_46 = arith.constant 0 : index
      %c0_47 = arith.constant 0 : index
      %42 = vector.load %arg9[%c0_45, %c0_46, %c0_47] : memref<4x8x8xf32, #tpu.memory_space<vmem>>, vector<4x8x8xf32>
      tpu.vector_store %arg9[%c0_45, %c0_46, %c0_47], %41 {strides = array<i32>} : memref<4x8x8xf32, #tpu.memory_space<vmem>>, vector<4x8x8xf32>,
    } else {
    }
    %c0 = arith.constant 0 : index
    %c0_1 = arith.constant 0 : index
    %c0_2 = arith.constant 0 : index
    %c0_3 = arith.constant 0 : index
    %3 = vector.load %arg3[%c0, %c0_1, %c0_2, %c0_3] : memref<1x4x8x8xf32, #tpu.memory_space<vmem>>, vector<1x4x8x8xf32>
    %4 = vector.shape_cast %3 : vector<1x4x8x8xf32> to vector<4x8x8xf32>
    %c0_4 = arith.constant 0 : index
    %c0_5 = arith.constant 0 : index
    %c0_6 = arith.constant 0 : index
    %c0_7 = arith.constant 0 : index
    %5 = vector.load %arg4[%c0_4, %c0_5, %c0_6, %c0_7] : memref<1x4x8x8xf32, #tpu.memory_space<vmem>>, vector<1x4x8x8xf32>
    %6 = vector.shape_cast %5 : vector<1x4x8x8xf32> to vector<4x8x8xf32>
    %c0_8 = arith.constant 0 : index
    %c0_9 = arith.constant 0 : index
    %c0_10 = arith.constant 0 : index
    %c0_11 = arith.constant 0 : index
    %7 = vector.load %arg5[%c0_8, %c0_9, %c0_10, %c0_11] : memref<1x4x8x8xf32, #tpu.memory_space<vmem>>, vector<1x4x8x8xf32>
    %8 = vector.shape_cast %7 : vector<1x4x8x8xf32> to vector<4x8x8xf32>
    %cst = arith.constant 0.353553385 : f32
    %9 = vector.broadcast %cst : f32 to vector<4x8x8xf32>
    %10 = arith.mulf %4, %9 : vector<4x8x8xf32>
    "tpu.trace_start"() <{level = 10 : i32, message = "hqd,hkd->hqk"}> : () -> ()
    %cst_12 = arith.constant dense<0.000000e+00> : vector<4x8x8xf32>
    %11 = tpu.matmul %10, %6, %cst_12 {dimension_numbers = #tpu.dot_dimension_numbers<[2], [2], [1], [1], [0, 0, 0, 1, 1, 1], [0], [0]>} : vector<4x8x8xf32>, vector<4x8x8xf32>, vector<4x8x8xf32> -> vector<4x8x8xf32>
    "tpu.trace_stop"() : () -> ()
    %c0_13 = arith.constant 0 : index
    %c0_14 = arith.constant 0 : index
    %c0_15 = arith.constant 0 : index
    %12 = vector.load %arg7[%c0_13, %c0_14, %c0_15] : memref<4x8x1xf32, #tpu.memory_space<vmem>>, vector<4x8x1xf32>
    %cst_16 = arith.constant dense<0xFF800000> : vector<4x8xf32>
    %13 = vector.multi_reduction <maximumf>, %11, %cst_16 [2] : vector<4x8x8xf32> to vector<4x8xf32>
    %14 = vector.shape_cast %13 : vector<4x8xf32> to vector<4x8x1xf32>
    %15 = arith.maximumf %12, %14 : vector<4x8x1xf32>
    %16 = arith.subf %12, %15 : vector<4x8x1xf32>
    %17 = math.exp %16 : vector<4x8x1xf32>
    %18 = vector.broadcast %15 : vector<4x8x1xf32> to vector<4x8x8xf32>
    %19 = arith.subf %11, %18 : vector<4x8x8xf32>
    %20 = math.exp %19 : vector<4x8x8xf32>
    %c0_17 = arith.constant 0 : index
    %c0_18 = arith.constant 0 : index
    %c0_19 = arith.constant 0 : index
    %21 = vector.load %arg8[%c0_17, %c0_18, %c0_19] : memref<4x8x1xf32, #tpu.memory_space<vmem>>, vector<4x8x1xf32>
    %22 = arith.mulf %17, %21 : vector<4x8x1xf32>
    %cst_20 = arith.constant dense<0.000000e+00> : vector<4x8xf32>
    %23 = vector.multi_reduction <add>, %20, %cst_20 [2] : vector<4x8x8xf32> to vector<4x8xf32>
    %24 = vector.shape_cast %23 : vector<4x8xf32> to vector<4x8x1xf32>
    %25 = arith.addf %22, %24 : vector<4x8x1xf32>
    %c0_21 = arith.constant 0 : index
    %c0_22 = arith.constant 0 : index
    %c0_23 = arith.constant 0 : index
    %26 = vector.load %arg8[%c0_21, %c0_22, %c0_23] : memref<4x8x1xf32, #tpu.memory_space<vmem>>, vector<4x8x1xf32>
    tpu.vector_store %arg8[%c0_21, %c0_22, %c0_23], %25 {strides = array<i32>} : memref<4x8x1xf32, #tpu.memory_space<vmem>>, vector<4x8x1xf32>,
    %c0_24 = arith.constant 0 : index
    %c0_25 = arith.constant 0 : index
    %c0_26 = arith.constant 0 : index
    %27 = vector.load %arg9[%c0_24, %c0_25, %c0_26] : memref<4x8x8xf32, #tpu.memory_space<vmem>>, vector<4x8x8xf32>
    %28 = vector.broadcast %17 : vector<4x8x1xf32> to vector<4x8x8xf32>
    %29 = arith.mulf %28, %27 : vector<4x8x8xf32>
    "tpu.trace_start"() <{level = 10 : i32, message = "hqk,hkd->hqd"}> : () -> ()
    %cst_27 = arith.constant dense<0.000000e+00> : vector<4x8x8xf32>
    %30 = tpu.matmul %20, %8, %cst_27 {dimension_numbers = #tpu.dot_dimension_numbers<[2], [1], [1], [2], [0, 0, 0, 1, 1, 2], [0], [0]>} : vector<4x8x8xf32>, vector<4x8x8xf32>, vector<4x8x8xf32> -> vector<4x8x8xf32>
    "tpu.trace_stop"() : () -> ()
    %31 = arith.addf %29, %30 : vector<4x8x8xf32>
    %c0_28 = arith.constant 0 : index
    %c0_29 = arith.constant 0 : index
    %c0_30 = arith.constant 0 : index
    %32 = vector.load %arg9[%c0_28, %c0_29, %c0_30] : memref<4x8x8xf32, #tpu.memory_space<vmem>>, vector<4x8x8xf32>
    tpu.vector_store %arg9[%c0_28, %c0_29, %c0_30], %31 {strides = array<i32>} : memref<4x8x8xf32, #tpu.memory_space<vmem>>, vector<4x8x8xf32>,
    %c0_31 = arith.constant 0 : index
    %c0_32 = arith.constant 0 : index
    %c0_33 = arith.constant 0 : index
    %33 = vector.load %arg7[%c0_31, %c0_32, %c0_33] : memref<4x8x1xf32, #tpu.memory_space<vmem>>, vector<4x8x1xf32>
    tpu.vector_store %arg7[%c0_31, %c0_32, %c0_33], %15 {strides = array<i32>} : memref<4x8x1xf32, #tpu.memory_space<vmem>>, vector<4x8x1xf32>,
    %c0_i32_34 = arith.constant 0 : i32
    %34 = arith.cmpi eq, %arg2, %c0_i32_34 : i32
    %35 = arith.extui %34 : i1 to i32
    %c0_i32_35 = arith.constant 0 : i32
    %36 = arith.cmpi ne, %35, %c0_i32_35 : i32
    scf.if %36 {
      %c0_36 = arith.constant 0 : index
      %c0_37 = arith.constant 0 : index
      %c0_38 = arith.constant 0 : index
      %37 = vector.load %arg8[%c0_36, %c0_37, %c0_38] : memref<4x8x1xf32, #tpu.memory_space<vmem>>, vector<4x8x1xf32>
      %38 = tpu.reciprocal %37 : vector<4x8x1xf32> -> vector<4x8x1xf32>
      %c0_39 = arith.constant 0 : index
      %c0_40 = arith.constant 0 : index
      %c0_41 = arith.constant 0 : index
      %39 = vector.load %arg9[%c0_39, %c0_40, %c0_41] : memref<4x8x8xf32, #tpu.memory_space<vmem>>, vector<4x8x8xf32>
      %40 = vector.broadcast %38 : vector<4x8x1xf32> to vector<4x8x8xf32>
      %41 = arith.mulf %39, %40 : vector<4x8x8xf32>
      %c0_42 = arith.constant 0 : index
      %c0_43 = arith.constant 0 : index
      %c0_44 = arith.constant 0 : index
      %c0_45 = arith.constant 0 : index
      %42 = vector.load %arg6[%c0_42, %c0_43, %c0_44, %c0_45] : memref<1x4x8x8xf32, #tpu.memory_space<vmem>>, vector<1x4x8x8xf32>
      %43 = vector.shape_cast %42 : vector<1x4x8x8xf32> to vector<4x8x8xf32>
      %44 = vector.shape_cast %41 : vector<4x8x8xf32> to vector<1x4x8x8xf32>
      tpu.vector_store %arg6[%c0_42, %c0_43, %c0_44, %c0_45], %44 {strides = array<i32>} : memref<1x4x8x8xf32, #tpu.memory_space<vmem>>, vector<1x4x8x8xf32>,
    } else {
    }
    return
  }
  func.func @transform_0(%arg0: i32, %arg1: i32, %arg2: i32) -> (i32, i32, i32, i32) {
    %c0_i32 = arith.constant 0 : i32
    %c0_i32_0 = arith.constant 0 : i32
    %c0_i32_1 = arith.constant 0 : i32
    return %arg0, %c0_i32, %arg1, %c0_i32_0 : i32, i32, i32, i32
  }
  func.func @transform_1(%arg0: i32, %arg1: i32, %arg2: i32) -> (i32, i32, i32, i32) {
    %c0_i32 = arith.constant 0 : i32
    %c0_i32_0 = arith.constant 0 : i32
    %c0_i32_1 = arith.constant 0 : i32
    return %arg0, %c0_i32, %arg2, %c0_i32_0 : i32, i32, i32, i32
  }
  func.func @transform_2(%arg0: i32, %arg1: i32, %arg2: i32) -> (i32, i32, i32, i32) {
    %c0_i32 = arith.constant 0 : i32
    %c0_i32_0 = arith.constant 0 : i32
    %c0_i32_1 = arith.constant 0 : i32
    return %arg0, %c0_i32, %arg2, %c0_i32_0 : i32, i32, i32, i32
  }
  func.func @transform_3(%arg0: i32, %arg1: i32, %arg2: i32) -> (i32, i32, i32, i32) {
    %c0_i32 = arith.constant 0 : i32
    %c0_i32_0 = arith.constant 0 : i32
    %c0_i32_1 = arith.constant 0 : i32
    return %arg0, %c0_i32, %arg1, %c0_i32_0 : i32, i32, i32, i32
  }
}

module attributes {stable_mosaic.version = 11 : i64} {
  func.func @ffn_kernel(%arg0: i32, %arg1: i32, %arg2: i32, %arg3: memref<1x8x32xf32, #tpu.memory_space<vmem>>, %arg4: memref<1x4x8x8xf32, #tpu.memory_space<vmem>>, %arg5: memref<1x32xf32, #tpu.memory_space<vmem>>, %arg6: memref<1x32xf32, #tpu.memory_space<vmem>>, %arg7: memref<32x64xf32, #tpu.memory_space<vmem>>, %arg8: memref<1x64xf32, #tpu.memory_space<vmem>>, %arg9: memref<64x32xf32, #tpu.memory_space<vmem>>, %arg10: memref<1x32xf32, #tpu.memory_space<vmem>>, %arg11: memref<1x8x32xf32, #tpu.memory_space<vmem>>, %arg12: memref<8x32xf32, #tpu.memory_space<vmem>>, %arg13: memref<8x32xf32, #tpu.memory_space<vmem>>, %arg14: memref<8x32xf32, #tpu.memory_space<vmem>>) attributes {dimension_semantics = [#tpu.dimension_semantics<parallel>, #tpu.dimension_semantics<parallel>, #tpu.dimension_semantics<arbitrary>], iteration_bounds = array<i64: 2, 1, 1>, scalar_prefetch = 0 : i64, scratch_operands = 3 : i64, tpu.core_type = #tpu.core_type<tc>, window_params = [{transform_indices = @transform_0, window_bounds = array<i64: 1, 8, 32>}, {transform_indices = @transform_1, window_bounds = array<i64: 1, 4, 8, 8>}, {pipeline_mode = #tpu.pipeline_mode<synchronous>, transform_indices = @transform_2, window_bounds = array<i64: 1, 32>}, {pipeline_mode = #tpu.pipeline_mode<synchronous>, transform_indices = @transform_3, window_bounds = array<i64: 1, 32>}, {transform_indices = @transform_4, window_bounds = array<i64: 32, 64>}, {transform_indices = @transform_5, window_bounds = array<i64: 1, 64>}, {transform_indices = @transform_6, window_bounds = array<i64: 64, 32>}, {pipeline_mode = #tpu.pipeline_mode<synchronous>, transform_indices = @transform_7, window_bounds = array<i64: 1, 32>}, {transform_indices = @transform_8, window_bounds = array<i64: 1, 8, 32>}]} {
    %c0_i32 = arith.constant 0 : i32
    %0 = arith.cmpi eq, %arg2, %c0_i32 : i32
    %1 = arith.extui %0 : i1 to i32
    %c0_i32_0 = arith.constant 0 : i32
    %2 = arith.cmpi ne, %1, %c0_i32_0 : i32
    scf.if %2 {
      %c0_16 = arith.constant 0 : index
      %c0_17 = arith.constant 0 : index
      %c0_18 = arith.constant 0 : index
      %21 = vector.load %arg3[%c0_16, %c0_17, %c0_18] : memref<1x8x32xf32, #tpu.memory_space<vmem>>, vector<1x8x32xf32>
      %22 = vector.shape_cast %21 : vector<1x8x32xf32> to vector<8x32xf32>
      %c0_19 = arith.constant 0 : index
      %c0_20 = arith.constant 0 : index
      %c0_21 = arith.constant 0 : index
      %c0_22 = arith.constant 0 : index
      %23 = vector.load %arg4[%c0_19, %c0_20, %c0_21, %c0_22] : memref<1x4x8x8xf32, #tpu.memory_space<vmem>>, vector<1x1x8x8xf32>
      %24 = vector.shape_cast %23 : vector<1x1x8x8xf32> to vector<8x8xf32>
      %c0_23 = arith.constant 0 : index
      %c0_24 = arith.constant 0 : index
      %25 = vector.load %arg12[%c0_23, %c0_24] : memref<8x32xf32, #tpu.memory_space<vmem>>, vector<8x8xf32>
      tpu.vector_store %arg12[%c0_23, %c0_24], %24 {strides = array<i32>} : memref<8x32xf32, #tpu.memory_space<vmem>>, vector<8x8xf32>,
      %c0_25 = arith.constant 0 : index
      %c1 = arith.constant 1 : index
      %c0_26 = arith.constant 0 : index
      %c0_27 = arith.constant 0 : index
      %26 = vector.load %arg4[%c0_25, %c1, %c0_26, %c0_27] : memref<1x4x8x8xf32, #tpu.memory_space<vmem>>, vector<1x1x8x8xf32>
      %27 = vector.shape_cast %26 : vector<1x1x8x8xf32> to vector<8x8xf32>
      %c0_28 = arith.constant 0 : index
      %c8 = arith.constant 8 : index
      %28 = vector.load %arg12[%c0_28, %c8] : memref<8x32xf32, #tpu.memory_space<vmem>>, vector<8x8xf32>
      tpu.vector_store %arg12[%c0_28, %c8], %27 {strides = array<i32>} : memref<8x32xf32, #tpu.memory_space<vmem>>, vector<8x8xf32>,
      %c0_29 = arith.constant 0 : index
      %c2 = arith.constant 2 : index
      %c0_30 = arith.constant 0 : index
      %c0_31 = arith.constant 0 : index
      %29 = vector.load %arg4[%c0_29, %c2, %c0_30, %c0_31] : memref<1x4x8x8xf32, #tpu.memory_space<vmem>>, vector<1x1x8x8xf32>
      %30 = vector.shape_cast %29 : vector<1x1x8x8xf32> to vector<8x8xf32>
      %c0_32 = arith.constant 0 : index
      %c16 = arith.constant 16 : index
      %31 = vector.load %arg12[%c0_32, %c16] : memref<8x32xf32, #tpu.memory_space<vmem>>, vector<8x8xf32>
      tpu.vector_store %arg12[%c0_32, %c16], %30 {strides = array<i32>} : memref<8x32xf32, #tpu.memory_space<vmem>>, vector<8x8xf32>,
      %c0_33 = arith.constant 0 : index
      %c3 = arith.constant 3 : index
      %c0_34 = arith.constant 0 : index
      %c0_35 = arith.constant 0 : index
      %32 = vector.load %arg4[%c0_33, %c3, %c0_34, %c0_35] : memref<1x4x8x8xf32, #tpu.memory_space<vmem>>, vector<1x1x8x8xf32>
      %33 = vector.shape_cast %32 : vector<1x1x8x8xf32> to vector<8x8xf32>
      %c0_36 = arith.constant 0 : index
      %c24 = arith.constant 24 : index
      %34 = vector.load %arg12[%c0_36, %c24] : memref<8x32xf32, #tpu.memory_space<vmem>>, vector<8x8xf32>
      tpu.vector_store %arg12[%c0_36, %c24], %33 {strides = array<i32>} : memref<8x32xf32, #tpu.memory_space<vmem>>, vector<8x8xf32>,
      %c0_37 = arith.constant 0 : index
      %c0_38 = arith.constant 0 : index
      %35 = vector.load %arg12[%c0_37, %c0_38] : memref<8x32xf32, #tpu.memory_space<vmem>>, vector<8x32xf32>
      %36 = arith.addf %35, %22 : vector<8x32xf32>
      %c0_39 = arith.constant 0 : index
      %c0_40 = arith.constant 0 : index
      %37 = vector.load %arg12[%c0_39, %c0_40] : memref<8x32xf32, #tpu.memory_space<vmem>>, vector<8x32xf32>
      tpu.vector_store %arg12[%c0_39, %c0_40], %36 {strides = array<i32>} : memref<8x32xf32, #tpu.memory_space<vmem>>, vector<8x32xf32>,
      %c0_41 = arith.constant 0 : index
      %c0_42 = arith.constant 0 : index
      %38 = vector.load %arg5[%c0_41, %c0_42] : memref<1x32xf32, #tpu.memory_space<vmem>>, vector<1x32xf32>
      %39 = vector.shape_cast %38 : vector<1x32xf32> to vector<32xf32>
      %c0_43 = arith.constant 0 : index
      %c0_44 = arith.constant 0 : index
      %40 = vector.load %arg6[%c0_43, %c0_44] : memref<1x32xf32, #tpu.memory_space<vmem>>, vector<1x32xf32>
      %41 = vector.shape_cast %40 : vector<1x32xf32> to vector<32xf32>
      %cst_45 = arith.constant dense<0.000000e+00> : vector<8xf32>
      %42 = vector.multi_reduction <add>, %36, %cst_45 [1] : vector<8x32xf32> to vector<8xf32>
      %43 = vector.shape_cast %42 : vector<8xf32> to vector<8x1xf32>
      %cst_46 = arith.constant 3.200000e+01 : f32
      %44 = vector.broadcast %cst_46 : f32 to vector<8x1xf32>
      %45 = arith.divf %43, %44 : vector<8x1xf32>
      %46 = vector.broadcast %45 : vector<8x1xf32> to vector<8x32xf32>
      %47 = arith.subf %36, %46 : vector<8x32xf32>
      %48 = arith.mulf %47, %47 : vector<8x32xf32>
      %cst_47 = arith.constant dense<0.000000e+00> : vector<8xf32>
      %49 = vector.multi_reduction <add>, %48, %cst_47 [1] : vector<8x32xf32> to vector<8xf32>
      %50 = vector.shape_cast %49 : vector<8xf32> to vector<8x1xf32>
      %cst_48 = arith.constant 3.200000e+01 : f32
      %51 = vector.broadcast %cst_48 : f32 to vector<8x1xf32>
      %52 = arith.divf %50, %51 : vector<8x1xf32>
      %53 = vector.broadcast %45 : vector<8x1xf32> to vector<8x32xf32>
      %54 = arith.subf %36, %53 : vector<8x32xf32>
      %cst_49 = arith.constant 9.99999974E-6 : f32
      %55 = vector.broadcast %cst_49 : f32 to vector<8x1xf32>
      %56 = arith.addf %52, %55 : vector<8x1xf32>
      %57 = math.rsqrt %56 : vector<8x1xf32>
      %58 = vector.broadcast %57 : vector<8x1xf32> to vector<8x32xf32>
      %59 = arith.mulf %54, %58 : vector<8x32xf32>
      %60 = vector.shape_cast %39 : vector<32xf32> to vector<1x32xf32>
      %61 = vector.broadcast %60 : vector<1x32xf32> to vector<8x32xf32>
      %62 = arith.mulf %59, %61 : vector<8x32xf32>
      %63 = vector.shape_cast %41 : vector<32xf32> to vector<1x32xf32>
      %64 = vector.broadcast %63 : vector<1x32xf32> to vector<8x32xf32>
      %65 = arith.addf %62, %64 : vector<8x32xf32>
      %c0_50 = arith.constant 0 : index
      %c0_51 = arith.constant 0 : index
      %66 = vector.load %arg13[%c0_50, %c0_51] : memref<8x32xf32, #tpu.memory_space<vmem>>, vector<8x32xf32>
      tpu.vector_store %arg13[%c0_50, %c0_51], %65 {strides = array<i32>} : memref<8x32xf32, #tpu.memory_space<vmem>>, vector<8x32xf32>,
      %cst_52 = arith.constant 0.000000e+00 : f32
      %67 = vector.broadcast %cst_52 : f32 to vector<8x32xf32>
      %c0_53 = arith.constant 0 : index
      %c0_54 = arith.constant 0 : index
      %68 = vector.load %arg14[%c0_53, %c0_54] : memref<8x32xf32, #tpu.memory_space<vmem>>, vector<8x32xf32>
      tpu.vector_store %arg14[%c0_53, %c0_54], %67 {strides = array<i32>} : memref<8x32xf32, #tpu.memory_space<vmem>>, vector<8x32xf32>,
    } else {
    }
    %c0 = arith.constant 0 : index
    %c0_1 = arith.constant 0 : index
    %3 = vector.load %arg13[%c0, %c0_1] : memref<8x32xf32, #tpu.memory_space<vmem>>, vector<8x32xf32>
    %c0_2 = arith.constant 0 : index
    %c0_3 = arith.constant 0 : index
    %4 = vector.load %arg7[%c0_2, %c0_3] : memref<32x64xf32, #tpu.memory_space<vmem>>, vector<32x64xf32>
    %cst = arith.constant dense<0.000000e+00> : vector<8x64xf32>
    %5 = tpu.matmul %3, %4, %cst {dimension_numbers = #tpu.dot_dimension_numbers<[1], [0], [0], [1], [0, 0, 1, 1], [], []>} : vector<8x32xf32>, vector<32x64xf32>, vector<8x64xf32> -> vector<8x64xf32>
    %c0_4 = arith.constant 0 : index
    %c0_5 = arith.constant 0 : index
    %6 = vector.load %arg8[%c0_4, %c0_5] : memref<1x64xf32, #tpu.memory_space<vmem>>, vector<1x64xf32>
    %7 = vector.shape_cast %6 : vector<1x64xf32> to vector<64xf32>
    %8 = vector.shape_cast %7 : vector<64xf32> to vector<1x64xf32>
    %9 = vector.broadcast %8 : vector<1x64xf32> to vector<8x64xf32>
    %10 = arith.addf %5, %9 : vector<8x64xf32>
    %cst_6 = arith.constant 0.000000e+00 : f32
    %11 = vector.broadcast %cst_6 : f32 to vector<8x64xf32>
    %12 = arith.maximumf %10, %11 : vector<8x64xf32>
    %c0_7 = arith.constant 0 : index
    %c0_8 = arith.constant 0 : index
    %13 = vector.load %arg14[%c0_7, %c0_8] : memref<8x32xf32, #tpu.memory_space<vmem>>, vector<8x32xf32>
    %c0_9 = arith.constant 0 : index
    %c0_10 = arith.constant 0 : index
    %14 = vector.load %arg9[%c0_9, %c0_10] : memref<64x32xf32, #tpu.memory_space<vmem>>, vector<64x32xf32>
    %cst_11 = arith.constant dense<0.000000e+00> : vector<8x32xf32>
    %15 = tpu.matmul %12, %14, %cst_11 {dimension_numbers = #tpu.dot_dimension_numbers<[1], [0], [0], [1], [0, 0, 1, 1], [], []>} : vector<8x64xf32>, vector<64x32xf32>, vector<8x32xf32> -> vector<8x32xf32>
    %16 = arith.addf %13, %15 : vector<8x32xf32>
    %c0_12 = arith.constant 0 : index
    %c0_13 = arith.constant 0 : index
    %17 = vector.load %arg14[%c0_12, %c0_13] : memref<8x32xf32, #tpu.memory_space<vmem>>, vector<8x32xf32>
    tpu.vector_store %arg14[%c0_12, %c0_13], %16 {strides = array<i32>} : memref<8x32xf32, #tpu.memory_space<vmem>>, vector<8x32xf32>,
    %c0_i32_14 = arith.constant 0 : i32
    %18 = arith.cmpi eq, %arg2, %c0_i32_14 : i32
    %19 = arith.extui %18 : i1 to i32
    %c0_i32_15 = arith.constant 0 : i32
    %20 = arith.cmpi ne, %19, %c0_i32_15 : i32
    scf.if %20 {
      %c0_16 = arith.constant 0 : index
      %c0_17 = arith.constant 0 : index
      %21 = vector.load %arg14[%c0_16, %c0_17] : memref<8x32xf32, #tpu.memory_space<vmem>>, vector<8x32xf32>
      %c0_18 = arith.constant 0 : index
      %c0_19 = arith.constant 0 : index
      %22 = vector.load %arg10[%c0_18, %c0_19] : memref<1x32xf32, #tpu.memory_space<vmem>>, vector<1x32xf32>
      %23 = vector.shape_cast %22 : vector<1x32xf32> to vector<32xf32>
      %24 = vector.shape_cast %23 : vector<32xf32> to vector<1x32xf32>
      %25 = vector.broadcast %24 : vector<1x32xf32> to vector<8x32xf32>
      %26 = arith.addf %21, %25 : vector<8x32xf32>
      %c0_20 = arith.constant 0 : index
      %c0_21 = arith.constant 0 : index
      %27 = vector.load %arg12[%c0_20, %c0_21] : memref<8x32xf32, #tpu.memory_space<vmem>>, vector<8x32xf32>
      %28 = arith.addf %26, %27 : vector<8x32xf32>
      %c0_22 = arith.constant 0 : index
      %c0_23 = arith.constant 0 : index
      %c0_24 = arith.constant 0 : index
      %29 = vector.load %arg11[%c0_22, %c0_23, %c0_24] : memref<1x8x32xf32, #tpu.memory_space<vmem>>, vector<1x8x32xf32>
      %30 = vector.shape_cast %29 : vector<1x8x32xf32> to vector<8x32xf32>
      %31 = vector.shape_cast %28 : vector<8x32xf32> to vector<1x8x32xf32>
      tpu.vector_store %arg11[%c0_22, %c0_23, %c0_24], %31 {strides = array<i32>} : memref<1x8x32xf32, #tpu.memory_space<vmem>>, vector<1x8x32xf32>,
    } else {
    }
    return
  }
  func.func @transform_0(%arg0: i32, %arg1: i32, %arg2: i32) -> (i32, i32, i32) {
    %c0_i32 = arith.constant 0 : i32
    %c0_i32_0 = arith.constant 0 : i32
    return %arg0, %arg1, %c0_i32 : i32, i32, i32
  }
  func.func @transform_1(%arg0: i32, %arg1: i32, %arg2: i32) -> (i32, i32, i32, i32) {
    %c0_i32 = arith.constant 0 : i32
    %c0_i32_0 = arith.constant 0 : i32
    %c0_i32_1 = arith.constant 0 : i32
    return %arg0, %c0_i32, %arg1, %c0_i32_0 : i32, i32, i32, i32
  }
  func.func @transform_2(%arg0: i32, %arg1: i32, %arg2: i32) -> (i32, i32) {
    %c0_i32 = arith.constant 0 : i32
    %c0_i32_0 = arith.constant 0 : i32
    %c0_i32_1 = arith.constant 0 : i32
    return %c0_i32, %c0_i32_0 : i32, i32
  }
  func.func @transform_3(%arg0: i32, %arg1: i32, %arg2: i32) -> (i32, i32) {
    %c0_i32 = arith.constant 0 : i32
    %c0_i32_0 = arith.constant 0 : i32
    %c0_i32_1 = arith.constant 0 : i32
    return %c0_i32, %c0_i32_0 : i32, i32
  }
  func.func @transform_4(%arg0: i32, %arg1: i32, %arg2: i32) -> (i32, i32) {
    %c0_i32 = arith.constant 0 : i32
    %c0_i32_0 = arith.constant 0 : i32
    return %c0_i32, %arg2 : i32, i32
  }
  func.func @transform_5(%arg0: i32, %arg1: i32, %arg2: i32) -> (i32, i32) {
    %c0_i32 = arith.constant 0 : i32
    %c0_i32_0 = arith.constant 0 : i32
    return %c0_i32, %arg2 : i32, i32
  }
  func.func @transform_6(%arg0: i32, %arg1: i32, %arg2: i32) -> (i32, i32) {
    %c0_i32 = arith.constant 0 : i32
    %c0_i32_0 = arith.constant 0 : i32
    return %arg2, %c0_i32 : i32, i32
  }
  func.func @transform_7(%arg0: i32, %arg1: i32, %arg2: i32) -> (i32, i32) {
    %c0_i32 = arith.constant 0 : i32
    %c0_i32_0 = arith.constant 0 : i32
    %c0_i32_1 = arith.constant 0 : i32
    return %c0_i32, %c0_i32_0 : i32, i32
  }
  func.func @transform_8(%arg0: i32, %arg1: i32, %arg2: i32) -> (i32, i32, i32) {
    %c0_i32 = arith.constant 0 : i32
    %c0_i32_0 = arith.constant 0 : i32
    return %arg0, %arg1, %c0_i32 : i32, i32, i32
  }
}

</mosaic_0001>

<bundles_post_ra>
// kernel: transformer_lm_layer.3
= control target key start
LH: loop header
LB: loop body
LE: loop exit
PB: predicated region body
PF: predicated region fallthrough
CT: control target
= control target key end

     0   :  { %s864_s24 = smov 0   ;;  %s866_s25 = smov 0   ;;  %s954_s0 = inlined_call_operand.vmem [shape: f32[2,8,32], index: 0, kind: input, shape index: {}]   ;;  %s955_s1 = inlined_call_operand.vmem [shape: f32[1,32], index: 1, kind: input, shape index: {}]   ;;  %s956_s2 = inlined_call_operand.vmem [shape: f32[1,32], index: 2, kind: input, shape index: {}]   ;;  %s957_s3 = inlined_call_operand.vmem [shape: f32[32,96], index: 3, kind: input, shape index: {}]   ;;  %s958_s4 = inlined_call_operand.vmem [shape: f32[1,96], index: 4, kind: input, shape index: {}]   ;;  %s959_s5 = inlined_call_operand.vmem [shape: f32[2,4,8,8], index: 5, kind: output, shape index: {0}]   ;;  %s960_s6 = inlined_call_operand.vmem [shape: f32[2,4,8,8], index: 6, kind: output, shape index: {1}]   ;;  %s961_s7 = inlined_call_operand.vmem [shape: f32[2,4,8,8], index: 7, kind: output, shape index: {2}]  }
   0x1   :  { %s868_s26 = smov 0  }
   0x2 LB: > { %s30_s27 = sadd.s32 1, %s804_s25  ;;  %p698_p0 = scmp.ge.s32.totalorder %s808_s26, 1  ;;  %s808_s26 = sphi %s868_s26, %s18_s26   ;;  %s804_s25 = sphi %s866_s25, %s963_s25   ;;  %s800_s24 = sphi %s864_s24, %s962_s24  }
   0x3   : > { %p32_p1 = scmp.ge.s32.totalorder %s30_s27, 2  ;;  %p264_p2 = scmp.lt.s32.totalorder %s808_s26, 3 }
   0x5   : > { %s965_s27 = smov (%p32_p1, %s30_s27), 0  ;;  %p265_p3 = pnand %p698_p0, %p264_p2 }
   0x6   : > { %p317_p4 = scmp.lt.s32.totalorder (!%p265_p3), %s800_s24, 1  ;;  %vm351_vm0 = vcmask (!%p265_p3), 261120   ;;  %v380_v7 = vld [vmem:[%s957_s3] sm:$0xff] (!%p265_p3)  ;;  %v381_v8 = vld [vmem:[%s957_s3 + $0x8] sm:$0xff] (!%p265_p3)  ;;  %v382_v9 = vld [vmem:[%s957_s3 + $0x10] sm:$0xff] (!%p265_p3)  ;;  %v810_v10 = vmov (!%p265_p3), 0.0|0.0  }
   0x7   : > { %268 = sbr.rel (%p265_p3) target bundleno = 693 (0x2b5), region = 40  ;;  %740 = vmatprep.subr.bf16.mxu0 (!%p265_p3), %v810_v10  ;;  %v741_v11 = vpack.c.bf16 (!%p265_p3), %v381_v8, %v380_v7  ;;  %v383_v12 = vld [vmem:[%s957_s3 + $0x18] sm:$0xff] (!%p265_p3)  ;;  %vm811_vm1 = vmmov (!%p265_p3), 0   ;;  %v812_v13 = vmov (!%p265_p3), 0.0   ;;  %v706_v19 = vld [vmem:[%s955_s1] ss:$0 sm:$0xff] (!%p265_p3) }
   0x8   : > { %737 = vmatprep.mubr.msk.f32.mxu0 (!%p265_p3), %vm811_vm1, %v812_v13  ;;  %v744_v14 = vpack.c.bf16 (!%p265_p3), %v383_v12, %v382_v9  ;;  %v707_v21 = vld [vmem:[%s956_s2] ss:$0 sm:$0xff] (!%p265_p3)  ;;  %vm464_vm2 = vcmask (!%p265_p3), 64512   ;;  %s814_s9 = smov (!%p265_p3), 96   ;;  %s816_s10 = smov (!%p265_p3), 64  }
   0x9   : > { %742 = vmatpush3.bf16.msra.mxu0 (!%p265_p3), %v741_v11  ;;  %v708_v24 = vld [vmem:[%s958_s4] ss:$0 sm:$0xff] (!%p265_p3)  ;;  %s817_s11 = smov (!%p265_p3), 88   ;;  %s818_s12 = smov (!%p265_p3), 56  }
   0xa   : > { %743 = vmatprep.subr.bf16.mxu0 (!%p265_p3), %v810_v10  ;;  %s819_s13 = smov (!%p265_p3), 112   ;;  %s820_s14 = smov (!%p265_p3), 80  }
   0xb   : > { %s821_s15 = smov (!%p265_p3), 48   ;;  %s822_s16 = smov (!%p265_p3), 104  }
   0xc   : > { %s823_s17 = smov (!%p265_p3), 40  }
   0xd   : > { %745 = vmatpush3.bf16.msra.mxu0 (!%p265_p3), %v744_v14 }
   0xe   : > { %s967_s24 = smov (!%p317_p4, %s800_s24), 1 }
   0xf   : > { %s699_s28 = sshll.u32 %s967_s24, 3  ;;  %s910_s21 = sshll.u32 %s967_s24, 5 }
  0x10   : > { %s323_s8 = scalar_lea.vmem %s954_s0, %s699_s28  ;;  %s919_s30 = scalar_lea.vmem %s959_s5, %s910_s21 }
  0x11   : > { %v348_v0 = vld [vmem:[%s323_s8] sm:$0xff]  ;;  %s813_s8 = smov 120   ;;  %s815_s24 = smov 72  }
  0x12   : > { %v352_v1 = vsel %vm351_vm0, %v348_v0, 0.0  ;;  %s339_s20 = scalar_lea.vmem %s960_s6, %s910_s21  ;;  %s347_s28 = scalar_lea.vmem %s961_s7, %s910_s21 }
  0x13   : > { %353 = vadd.xlane.f32.xlu0 %v352_v1 }
  0xa0   : > { %v354_v2 = vpop.xlane.xlu0 %353 }
  0xa1   : > { %v356_v3 = vmul.f32 0.03125, %v354_v2 }
  0xa3   : > { %v357_v4 = vsub.f32 %v348_v0, %v356_v3 }
  0xa5   : > { %v358_v5 = vmul.f32 %v357_v4, %v357_v4 }
  0xa7   : > { %v359_v6 = vsel %vm351_vm0, %v358_v5, 0.0 }
  0xa8   : > { %360 = vadd.xlane.f32.xlu0 %v359_v6 }
 0x135   : > { %v361_v15 = vpop.xlane.xlu0 %360 }
 0x136   : > { %v362_v16 = vmul.f32 0.03125, %v361_v15 }
 0x138   : > { %v363_v17 = vadd.f32 1e-05, %v362_v16 }
 0x13a   : > { %784 = vrsqrt.f32 %v363_v17 }
 0x144   : > { %v785_v18 = vpop.eup %784 }
 0x145   : > { %v365_v20 = vmul.f32 %v785_v18, %v357_v4 }
 0x147   : > { %v372_v22 = vmul.f32 %v706_v19, %v365_v20 }
 0x149   : > { %v379_v23 = vadd.f32 %v707_v21, %v372_v22 }
 0x14b   : > { %738 = vmatmul.mubr.msk.f32.vlgmr.msra.gmra.mrb[0].mxu0 %vm351_vm0, %v379_v23 }
 0x21e   : > { %v460_v25 = vpop.f32.mrb[0].mxu0 }
 0x21f   : > { %v461_v26 = vadd.f32 %v708_v24, %v460_v25  ;;  %v739_v27 = vpop.f32.mrb[1].mxu0 }
 0x221   : > { %475 = vrot.lane.b32.xlu0 %v461_v26, %s813_s8  ;;  %467 = vrot.lane.b32.xlu1 %v461_v26, %s814_s9  ;;  %465 = vst.msk [vmem:[%s919_s30] sm:$0xff] %vm464_vm2, %v461_v26 }
 0x225   : > { %510 = vrot.lane.b32.xlu0 %v461_v26, %s815_s24  ;;  %471 = vrot.lane.b32.xlu1 %v461_v26, %s816_s10 }
 0x229   : > { %480 = vrot.lane.b32.xlu1 %v461_v26, %s817_s11 }
 0x22d   : > { %485 = vrot.lane.b32.xlu1 %v461_v26, %s818_s12 }
 0x231   : > { %490 = vrot.lane.b32.xlu1 %v461_v26, %s819_s13 }
 0x235   : > { %495 = vrot.lane.b32.xlu1 %v461_v26, %s820_s14 }
 0x239   : > { %500 = vrot.lane.b32.xlu1 %v461_v26, %s821_s15 }
 0x23d   : > { %505 = vrot.lane.b32.xlu1 %v461_v26, %s822_s16 }
 0x241   : > { %515 = vrot.lane.b32.xlu1 %v461_v26, %s823_s17 }
 0x293   : > { %v476_v28 = vpop.permute.xlu0 %475  ;;  %v468_v29 = vpop.permute.xlu1 %467 }
 0x294   : > { %710 = vst.msk [vmem:[%s919_s30 + $0x8] sm:$0xff] %vm464_vm2, %v476_v28  ;;  %470 = vst.msk [vmem:[%s339_s20] sm:$0xff] %vm464_vm2, %v468_v29 }
 0x297   : > { %v511_v30 = vpop.permute.xlu0 %510  ;;  %v472_v31 = vpop.permute.xlu1 %471 }
 0x298   : > { %717 = vst.msk [vmem:[%s339_s20 + $0x18] sm:$0xff] %vm464_vm2, %v511_v30  ;;  %474 = vst.msk [vmem:[%s347_s28] sm:$0xff] %vm464_vm2, %v472_v31 }
 0x29b   : > { %v481_v32 = vpop.permute.xlu1 %480 }
 0x29c   : > { %711 = vst.msk [vmem:[%s339_s20 + $0x8] sm:$0xff] %vm464_vm2, %v481_v32 }
 0x29f   : > { %v486_v33 = vpop.permute.xlu1 %485 }
 0x2a0   : > { %712 = vst.msk [vmem:[%s347_s28 + $0x8] sm:$0xff] %vm464_vm2, %v486_v33 }
 0x2a3   : > { %v491_v34 = vpop.permute.xlu1 %490 }
 0x2a4   : > { %713 = vst.msk [vmem:[%s919_s30 + $0x10] sm:$0xff] %vm464_vm2, %v491_v34 }
 0x2a7   : > { %v496_v35 = vpop.permute.xlu1 %495 }
 0x2a8   : > { %714 = vst.msk [vmem:[%s339_s20 + $0x10] sm:$0xff] %vm464_vm2, %v496_v35 }
 0x2ab   : > { %v501_v36 = vpop.permute.xlu1 %500 }
 0x2ac   : > { %715 = vst.msk [vmem:[%s347_s28 + $0x10] sm:$0xff] %vm464_vm2, %v501_v36 }
 0x2af   : > { %v506_v37 = vpop.permute.xlu1 %505 }
 0x2b0   : > { %716 = vst.msk [vmem:[%s919_s30 + $0x18] sm:$0xff] %vm464_vm2, %v506_v37 }
 0x2b3   : > { %v516_v38 = vpop.permute.xlu1 %515 }
 0x2b4   : > { %718 = vst.msk [vmem:[%s347_s28 + $0x18] sm:$0xff] %vm464_vm2, %v516_v38 }
 0x2b5 PF: > { %s18_s26 = sadd.s32 1, %s808_s26   ;;  %s962_s24 = smov %s804_s25 }
 0x2b6   : > { %p15_p5 = scmp.ge.s32.totalorder %s18_s26, 4   ;;  %s963_s25 = smov %s965_s27 }
 0x2b8   :  { %17 = sbr.rel (!%p15_p5) target bundleno = 2 (0x2), region = 103 }

// kernel: transformer_lm_layer.4
= control target key start
LH: loop header
LB: loop body
LE: loop exit
PB: predicated region body
PF: predicated region fallthrough
CT: control target
= control target key end

     0   :  { %s1389_s12 = smov 0   ;;  %s1391_s13 = smov 0   ;;  %s1538_s0 = inlined_call_operand.vmem [shape: f32[2,4,8,8], index: 0, kind: input, shape index: {}]   ;;  %s1539_s1 = inlined_call_operand.vmem [shape: f32[2,4,8,8], index: 1, kind: input, shape index: {}]   ;;  %s1540_s2 = inlined_call_operand.vmem [shape: f32[2,4,8,8], index: 2, kind: input, shape index: {}]   ;;  %s1541_s3 = inlined_call_operand.vmem [shape: f32[2,4,8,8], index: 3, kind: output, shape index: {}]  }
   0x1   :  { %s1393_s14 = smov 0  }
   0x2 LB: > { %s32_s15 = sadd.s32 1, %s1359_s13  ;;  %p1204_p0 = scmp.ge.s32.totalorder %s1363_s14, 1  ;;  %s1363_s14 = sphi %s1393_s14, %s13_s14   ;;  %s1359_s13 = sphi %s1391_s13, %s1543_s13   ;;  %s1355_s12 = sphi %s1389_s12, %s1542_s12  }
   0x3   : > { %p34_p1 = scmp.ge.s32.totalorder %s32_s15, 2  ;;  %p193_p2 = scmp.lt.s32.totalorder %s1363_s14, 3 }
   0x5   : > { %s1545_s15 = smov (%p34_p1, %s32_s15), 0  ;;  %p194_p3 = pnand %p1204_p0, %p193_p2 }
   0x6   : > { %p239_p4 = scmp.lt.s32.totalorder (!%p194_p3), %s1355_s12, 1  ;;  %vm284_vm0 = vcmask (!%p194_p3), 64512   ;;  %v1365_v0 = vmov (!%p194_p3), 0.0   ;;  %vm1366_vm1 = vmmov (!%p194_p3), 0   ;;  %vm275_vm2 = vcmask (!%p194_p3), 7168  }
   0x7   : > { %197 = sbr.rel (%p194_p3) target bundleno = 828 (0x33c), region = 32  ;;  %1247 = vmatprep.subr.mxu0 (!%p194_p3), %v1365_v0  ;;  %285 = vst.msk [vmem:[#allocation4] sm:$0xff] (!%p194_p3), %vm284_vm0, %v1365_v0  ;;  %286 = vst.msk [vmem:[#allocation4 + $0x8] sm:$0xff] (!%p194_p3), %vm284_vm0, %v1365_v0  ;;  %1249 = vmatprep.mubr.msk.f32.mxu0 (!%p194_p3), %vm1366_vm1, %v1365_v0  ;;  %v1367_v13 = vmov (!%p194_p3), -inf   ;;  %v1368_v26 = vmov (!%p194_p3), 0  }
   0x8   : > { %287 = vst.msk [vmem:[#allocation4 + $0x10] sm:$0xff] (!%p194_p3), %vm284_vm0, %v1365_v0  ;;  %288 = vst.msk [vmem:[#allocation4 + $0x18] sm:$0xff] (!%p194_p3), %vm284_vm0, %v1365_v0  ;;  %1252 = vmatprep.subr.mxu1 (!%p194_p3), %v1365_v0  ;;  %1254 = vmatprep.mubr.msk.f32.mxu1 (!%p194_p3), %vm1366_vm1, %v1365_v0 }
   0x9   : > { %276 = vst.msk [vmem:[#allocation2] sm:$0xff] (!%p194_p3), %vm275_vm2, %v1367_v13  ;;  %277 = vst.msk [vmem:[#allocation2 + $0x8] sm:$0xff] (!%p194_p3), %vm275_vm2, %v1367_v13  ;;  %1315 = vset.pattern.permute.xlu0 (!%p194_p3), %v1368_v26  ;;  %1316 = vset.pattern.permute.xlu1 (!%p194_p3), %v1368_v26 }
   0xa   : > { %278 = vst.msk [vmem:[#allocation2 + $0x10] sm:$0xff] (!%p194_p3), %vm275_vm2, %v1367_v13  ;;  %279 = vst.msk [vmem:[#allocation2 + $0x18] sm:$0xff] (!%p194_p3), %vm275_vm2, %v1367_v13 }
   0xb   : > { %280 = vst.msk [vmem:[#allocation3] sm:$0xff] (!%p194_p3), %vm275_vm2, %v1365_v0  ;;  %281 = vst.msk [vmem:[#allocation3 + $0x8] sm:$0xff] (!%p194_p3), %vm275_vm2, %v1365_v0 }
   0xc   : > { %282 = vst.msk [vmem:[#allocation3 + $0x10] sm:$0xff] (!%p194_p3), %vm275_vm2, %v1365_v0  ;;  %283 = vst.msk [vmem:[#allocation3 + $0x18] sm:$0xff] (!%p194_p3), %vm275_vm2, %v1365_v0 }
   0xe   : > { %s1547_s12 = smov (!%p239_p4, %s1355_s12), 1 }
   0xf   : > { %s1421_s16 = sshll.u32 %s1547_s12, 5 }
  0x10   : > { %s254_s19 = scalar_lea.vmem %s1539_s1, %s1421_s16  ;;  %s246_s22 = scalar_lea.vmem %s1538_s0, %s1421_s16  ;;  %v1467_v27 = vld [vmem:[#allocation2] sm:$0xff]  ;;  %v1472_v30 = vld [vmem:[#allocation2 + $0x8] sm:$0xff] }
  0x11   : > { %v293_v1 = vld [vmem:[%s254_s19] sm:$0xff]  ;;  %v294_v3 = vld [vmem:[%s254_s19 + $0x8] sm:$0xff]  ;;  %v291_v6 = vld [vmem:[%s246_s22 + $0x10] sm:$0xff]  ;;  %s262_s25 = scalar_lea.vmem %s1540_s2, %s1421_s16  ;;  %s270_s28 = scalar_lea.vmem %s1541_s3, %s1421_s16 }
  0x12   : > { %v289_v2 = vld [vmem:[%s246_s22] sm:$0xff]  ;;  %1248 = vmatpush3.xpose.msk.msra.mxu0 %vm284_vm0, %v293_v1  ;;  %1253 = vmatpush3.xpose.msk.msra.mxu1 %vm284_vm0, %v294_v3  ;;  %v290_v5 = vld [vmem:[%s246_s22 + $0x8] sm:$0xff]  ;;  %v295_v8 = vld [vmem:[%s254_s19 + $0x10] sm:$0xff]  ;;  %v303_v11 = vmul.f32 0.35355338, %v291_v6 }
  0x13   : > { %v301_v4 = vmul.f32 0.35355338, %v289_v2  ;;  %v302_v7 = vmul.f32 0.35355338, %v290_v5  ;;  %1257 = vmatprep.subr.mxu0 %v1365_v0  ;;  %1262 = vmatprep.subr.mxu1 %v1365_v0  ;;  %v292_v9 = vld [vmem:[%s246_s22 + $0x18] sm:$0xff]  ;;  %v1474_v31 = vld [vmem:[#allocation2 + $0x10] sm:$0xff] }
  0x14   : > { %v296_v10 = vld [vmem:[%s254_s19 + $0x18] sm:$0xff]  ;;  %v304_v12 = vmul.f32 0.35355338, %v292_v9  ;;  %v297_v43 = vld [vmem:[%s262_s25] sm:$0xff]  ;;  %v298_v44 = vld [vmem:[%s262_s25 + $0x8] sm:$0xff] }
  0x15   : > { %1250 = vmatmul.mubr.msk.f32.vlgmr.msra.gmra.mrb[0].mxu0 %vm284_vm0, %v301_v4  ;;  %1255 = vmatmul.mubr.msk.f32.vlgmr.msra.gmra.mrb[0].mxu1 %vm284_vm0, %v302_v7  ;;  %v1483_v37 = vld [vmem:[#allocation2 + $0x18] sm:$0xff]  ;;  %v299_v56 = vld [vmem:[%s262_s25 + $0x10] sm:$0xff] }
  0x16   : > { %1258 = vmatpush3.xpose.msk.msra.mxu0 %vm284_vm0, %v295_v8  ;;  %1259 = vmatprep.mubr.msk.f32.mxu0 %vm1366_vm1, %v1365_v0  ;;  %v300_v60 = vld [vmem:[%s262_s25 + $0x18] sm:$0xff] }
  0x17   : > { %1263 = vmatpush3.xpose.msk.msra.mxu1 %vm284_vm0, %v296_v10  ;;  %1264 = vmatprep.mubr.msk.f32.mxu1 %vm1366_vm1, %v1365_v0 }
  0x18   : > { %1267 = vmatprep.subr.mxu0 %v1365_v0  ;;  %1272 = vmatprep.subr.mxu1 %v1365_v0 }
  0x19   : > { %1260 = vmatmul.mubr.msk.f32.vlgmr.msra.gmra.mrb[2].mxu0 %vm284_vm0, %v303_v11  ;;  %v674_v11 = vld [vmem:[#allocation3] sm:$0xff] }
  0x1a   : > { %1265 = vmatmul.mubr.msk.f32.vlgmr.msra.gmra.mrb[2].mxu1 %vm284_vm0, %v304_v12  ;;  %1269 = vmatprep.mubr.msk.f32.mxu0 %vm1366_vm1, %v1365_v0 }
  0x1b   : > { %1274 = vmatprep.mubr.msk.f32.mxu1 %vm1366_vm1, %v1365_v0  ;;  %1268 = vmatpush3.msra.mxu0 %v297_v43 }
  0x1c   : > { %1277 = vmatprep.subr.mxu0 %v1365_v0  ;;  %1273 = vmatpush3.msra.mxu1 %v298_v44 }
  0x1d   : > { %1282 = vmatprep.subr.mxu1 %v1365_v0 }
  0xe8   : > { %v378_v14 = vpop.f32.mrb[0].mxu0  ;;  %v454_v15 = vpop.f32.mrb[0].mxu1 }
  0xe9   : > { %v1251_v16 = vpop.f32.mrb[1].mxu0  ;;  %v614_v17 = vsel %vm284_vm0, %v378_v14, -inf  ;;  %v1256_v18 = vpop.f32.mrb[1].mxu1  ;;  %v617_v19 = vsel %vm284_vm0, %v454_v15, -inf }
  0xea   : > { %615 = vmax.xlane.f32.xlu0 %v614_v17  ;;  %v676_v18 = vld [vmem:[#allocation3 + $0x10] sm:$0xff] }
  0xec   : > { %v530_v20 = vpop.f32.mrb[2].mxu0 }
  0xed   : > { %v1261_v21 = vpop.f32.mrb[3].mxu0  ;;  %v620_v22 = vsel %vm284_vm0, %v530_v20, -inf  ;;  %v606_v23 = vpop.f32.mrb[2].mxu1 }
  0xee   : > { %618 = vmax.xlane.f32.xlu0 %v617_v19  ;;  %621 = vmax.xlane.f32.xlu1 %v620_v22  ;;  %v1266_v24 = vpop.f32.mrb[3].mxu1  ;;  %v623_v25 = vsel %vm284_vm0, %v606_v23, -inf  ;;  %v677_v22 = vld [vmem:[#allocation3 + $0x18] sm:$0xff] }
  0xf2   : > { %624 = vmax.xlane.f32.xlu1 %v623_v25 }
 0x177   : > { %v616_v28 = vpop.xlane.xlu0 %615 }
 0x178   : > { %v1470_v29 = vmax.f32 %v1467_v27, %v616_v28 }
 0x17a   : > { %v630_v32 = vsub.f32 %v1467_v27, %v1470_v29  ;;  %1031 = vst.msk [vmem:[#allocation2] sm:$0xff] %vm275_vm2, %v1470_v29  ;;  %644 = vperm.xlu0 %1315, %v1470_v29  }
 0x17b   : > { %v619_v33 = vpop.xlane.xlu0 %618  ;;  %v622_v34 = vpop.xlane.xlu1 %621 }
 0x17c   : > { %v627_v35 = vmax.f32 %v1472_v30, %v619_v33  ;;  %v628_v36 = vmax.f32 %v1474_v31, %v622_v34  ;;  %v634_v5 = vmul.f32 1.442695, %v630_v32 }
 0x17e   : > { %v631_v38 = vsub.f32 %v1472_v30, %v627_v35  ;;  %1032 = vst.msk [vmem:[#allocation2 + $0x8] sm:$0xff] %vm275_vm2, %v627_v35  ;;  %649 = vperm.xlu1 %1316, %v627_v35   ;;  %v632_v39 = vsub.f32 %v1474_v31, %v628_v36  ;;  %1033 = vst.msk [vmem:[#allocation2 + $0x10] sm:$0xff] %vm275_vm2, %v628_v36  ;;  %v703_v35 = vld [vmem:[#allocation4] sm:$0xff] }
 0x17f   : > { %v625_v40 = vpop.xlane.xlu1 %624 }
 0x180   : > { %v629_v41 = vmax.f32 %v1483_v37, %v625_v40  ;;  %v636_v3 = vmul.f32 1.442695, %v631_v38  ;;  %v704_v38 = vld [vmem:[#allocation4 + $0x8] sm:$0xff] }
 0x182   : > { %654 = vperm.xlu1 %1316, %v628_v36   ;;  %v633_v42 = vsub.f32 %v1483_v37, %v629_v41  ;;  %1034 = vst.msk [vmem:[#allocation2 + $0x18] sm:$0xff] %vm275_vm2, %v629_v41 }
 0x184   : > { %v640_v6 = vmul.f32 1.442695, %v633_v42 }
 0x186   : > { %659 = vperm.xlu1 %1316, %v629_v41  }
 0x1f9   : > { %v645_v45 = vpop.permute.xlu0 %644 }
 0x1fa   : > { %v662_v46 = vsub.f32 %v378_v14, %v645_v45  ;;  %v675_v14 = vld [vmem:[#allocation3 + $0x8] sm:$0xff]  ;;  %v705_v45 = vld [vmem:[#allocation4 + $0x10] sm:$0xff] }
 0x1fc   : > { %v666_v47 = vmul.f32 1.442695, %v662_v46 }
 0x1fd   : > { %v650_v48 = vpop.permute.xlu1 %649 }
 0x1fe   : > { %1317 = vpow2.f32 %v666_v47  ;;  %v663_v49 = vsub.f32 %v454_v15, %v650_v48 }
 0x200   : > { %v668_v50 = vmul.f32 1.442695, %v663_v49 }
 0x201   : > { %v655_v51 = vpop.permute.xlu1 %654 }
 0x202   : > { %1319 = vpow2.f32 %v668_v50  ;;  %v664_v52 = vsub.f32 %v530_v20, %v655_v51  ;;  %v706_v50 = vld [vmem:[#allocation4 + $0x18] sm:$0xff] }
 0x204   : > { %v670_v53 = vmul.f32 1.442695, %v664_v52 }
 0x205   : > { %v660_v54 = vpop.permute.xlu1 %659 }
 0x206   : > { %1321 = vpow2.f32 %v670_v53  ;;  %v665_v55 = vsub.f32 %v606_v23, %v660_v54 }
 0x208   : > { %v1318_v57 = vpop.eup %1317  ;;  %v672_v58 = vmul.f32 1.442695, %v665_v55 }
 0x209   : > { %1270 = vmatmul.mubr.msk.f32.vlgmr.msra.gmra.mrb[4].mxu0 %vm284_vm0, %v1318_v57  ;;  %v682_v59 = vsel %vm284_vm0, %v1318_v57, 0.0 }
 0x20a   : > { %1323 = vpow2.f32 %v672_v58  ;;  %683 = vadd.xlane.f32.xlu1 %v682_v59  ;;  %1278 = vmatpush3.msra.mxu0 %v299_v56 }
 0x20b   : > { %1279 = vmatprep.mubr.msk.f32.mxu0 %vm1366_vm1, %v1365_v0  ;;  %1325 = vpow2.f32 %v636_v3 }
 0x20c   : > { %v1320_v61 = vpop.eup %1319  ;;  %1327 = vpow2.f32 %v634_v5 }
 0x20d   : > { %1275 = vmatmul.mubr.msk.f32.vlgmr.msra.gmra.mrb[4].mxu1 %vm284_vm0, %v1320_v61  ;;  %v685_v62 = vsel %vm284_vm0, %v1320_v61, 0.0 }
 0x20e   : > { %686 = vadd.xlane.f32.xlu0 %v685_v62  ;;  %1283 = vmatpush3.msra.mxu1 %v300_v60 }
 0x20f   : > { %1284 = vmatprep.mubr.msk.f32.mxu1 %vm1366_vm1, %v1365_v0  ;;  %v638_v0 = vmul.f32 1.442695, %v632_v39 }
 0x210   : > { %v1322_v63 = vpop.eup %1321 }
 0x211   : > { %1280 = vmatmul.mubr.msk.f32.vlgmr.msra.gmra.mrb[6].mxu0 %vm284_vm0, %v1322_v63  ;;  %v688_v1 = vsel %vm284_vm0, %v1322_v63, 0.0  ;;  %1329 = vpow2.f32 %v638_v0 }
 0x212   : > { %689 = vadd.xlane.f32.xlu1 %v688_v1  ;;  %1331 = vpow2.f32 %v640_v6 }
 0x214   : > { %v1324_v2 = vpop.eup %1323 }
 0x215   : > { %1285 = vmatmul.mubr.msk.f32.vlgmr.msra.gmra.mrb[6].mxu1 %vm284_vm0, %v1324_v2  ;;  %v691_v4 = vsel %vm284_vm0, %v1324_v2, 0.0  ;;  %v1326_v7 = vpop.eup %1325 }
 0x216   : > { %692 = vadd.xlane.f32.xlu1 %v691_v4  ;;  %v1328_v8 = vpop.eup %1327  ;;  %v679_v16 = vmul.f32 %v1326_v7, %v675_v14 }
 0x217   : > { %v678_v12 = vmul.f32 %v1328_v8, %v674_v11 }
 0x21b   : > { %v1330_v9 = vpop.eup %1329 }
 0x21c   : > { %v1332_v10 = vpop.eup %1331  ;;  %v680_v20 = vmul.f32 %v1330_v9, %v676_v18 }
 0x21d   : > { %v681_v25 = vmul.f32 %v1332_v10, %v677_v22 }
 0x224   : > { %714 = vperm.xlu0 %1315, %v1326_v7  }
 0x227   : > { %709 = vperm.xlu1 %1316, %v1328_v8  }
 0x22b   : > { %719 = vperm.xlu1 %1316, %v1330_v9  }
 0x22f   : > { %724 = vperm.xlu1 %1316, %v1332_v10  }
 0x297   : > { %v684_v13 = vpop.xlane.xlu1 %683 }
 0x298   : > { %v694_v15 = vadd.f32 %v684_v13, %v678_v12 }
 0x29a   : > { %699 = vst.msk [vmem:[#allocation3] sm:$0xff] %vm275_vm2, %v694_v15 }
 0x29b   : > { %v687_v17 = vpop.xlane.xlu0 %686 }
 0x29c   : > { %v695_v19 = vadd.f32 %v687_v17, %v679_v16 }
 0x29e   : > { %700 = vst.msk [vmem:[#allocation3 + $0x8] sm:$0xff] %vm275_vm2, %v695_v19 }
 0x29f   : > { %v690_v21 = vpop.xlane.xlu1 %689 }
 0x2a0   : > { %v696_v23 = vadd.f32 %v690_v21, %v680_v20 }
 0x2a1   : > { %v1038_v24 = vld [vmem:[#allocation3] sm:$0xff] }
 0x2a2   : > { %701 = vst.msk [vmem:[#allocation3 + $0x10] sm:$0xff] %vm275_vm2, %v696_v23  ;;  %1333 = vrcp.f32 %v1038_v24 }
 0x2a3   : > { %v693_v26 = vpop.xlane.xlu1 %692  ;;  %v715_v39 = vpop.permute.xlu0 %714 }
 0x2a4   : > { %v697_v27 = vadd.f32 %v693_v26, %v681_v25  ;;  %v728_v44 = vmul.f32 %v715_v39, %v704_v38 }
 0x2a5   : > { %v1039_v28 = vld [vmem:[#allocation3 + $0x8] sm:$0xff] }
 0x2a6   : > { %702 = vst.msk [vmem:[#allocation3 + $0x18] sm:$0xff] %vm275_vm2, %v697_v27  ;;  %1335 = vrcp.f32 %v1039_v28 }
 0x2a7   : > { %v710_v36 = vpop.permute.xlu1 %709 }
 0x2a8   : > { %v727_v37 = vmul.f32 %v710_v36, %v703_v35 }
 0x2a9   : > { %v1040_v29 = vld [vmem:[#allocation3 + $0x10] sm:$0xff] }
 0x2aa   : > { %1337 = vrcp.f32 %v1040_v29 }
 0x2ab   : > { %v720_v43 = vpop.permute.xlu1 %719 }
 0x2ac   : > { %v1334_v30 = vpop.eup %1333  ;;  %v729_v49 = vmul.f32 %v720_v43, %v705_v45 }
 0x2ad   : > { %1052 = vperm.xlu1 %1316, %v1334_v30   ;;  %v1041_v31 = vld [vmem:[#allocation3 + $0x18] sm:$0xff] }
 0x2ae   : > { %1339 = vrcp.f32 %v1041_v31 }
 0x2af   : > { %v725_v51 = vpop.permute.xlu1 %724 }
 0x2b0   : > { %v1336_v32 = vpop.eup %1335  ;;  %v730_v55 = vmul.f32 %v725_v51, %v706_v50 }
 0x2b1   : > { %1057 = vperm.xlu0 %1315, %v1336_v32  }
 0x2b4   : > { %v1338_v33 = vpop.eup %1337 }
 0x2b5   : > { %1062 = vperm.xlu1 %1316, %v1338_v33  }
 0x2b8   : > { %v1340_v34 = vpop.eup %1339 }
 0x2b9   : > { %1067 = vperm.xlu0 %1315, %v1340_v34  }
 0x2dc   : > { %v800_v40 = vpop.f32.mrb[4].mxu0 }
 0x2dd   : > { %v1023_v41 = vadd.f32 %v800_v40, %v727_v37  ;;  %v1271_v42 = vpop.f32.mrb[5].mxu0 }
 0x2df   : > { %1027 = vst.msk [vmem:[#allocation4] sm:$0xff] %vm284_vm0, %v1023_v41 }
 0x2e0   : > { %v873_v46 = vpop.f32.mrb[4].mxu1 }
 0x2e1   : > { %v1024_v47 = vadd.f32 %v873_v46, %v728_v44  ;;  %v1276_v48 = vpop.f32.mrb[5].mxu1 }
 0x2e3   : > { %1028 = vst.msk [vmem:[#allocation4 + $0x8] sm:$0xff] %vm284_vm0, %v1024_v47 }
 0x2e4   : > { %v946_v52 = vpop.f32.mrb[6].mxu0 }
 0x2e5   : > { %v1025_v53 = vadd.f32 %v946_v52, %v729_v49  ;;  %v1281_v54 = vpop.f32.mrb[7].mxu0 }
 0x2e6   : > { %v1046_v60 = vld [vmem:[#allocation4] sm:$0xff] }
 0x2e7   : > { %1029 = vst.msk [vmem:[#allocation4 + $0x10] sm:$0xff] %vm284_vm0, %v1025_v53 }
 0x2e8   : > { %v1019_v56 = vpop.f32.mrb[6].mxu1 }
 0x2e9   : > { %v1026_v57 = vadd.f32 %v1019_v56, %v730_v55  ;;  %v1286_v58 = vpop.f32.mrb[7].mxu1 }
 0x2ea   : > { %v1047_v62 = vld [vmem:[#allocation4 + $0x8] sm:$0xff] }
 0x2eb   : > { %1030 = vst.msk [vmem:[#allocation4 + $0x18] sm:$0xff] %vm284_vm0, %v1026_v57 }
 0x2ee   : > { %v1048_v3 = vld [vmem:[#allocation4 + $0x10] sm:$0xff] }
 0x2f2   : > { %v1049_v0 = vld [vmem:[#allocation4 + $0x18] sm:$0xff] }
 0x32c   : > { %v1053_v59 = vpop.permute.xlu1 %1052 }
 0x32d   : > { %v1070_v61 = vmul.f32 %v1053_v59, %v1046_v60 }
 0x32f   : > { %1074 = vst.msk [vmem:[%s270_s28] sm:$0xff] %vm284_vm0, %v1070_v61 }
 0x330   : > { %v1058_v63 = vpop.permute.xlu0 %1057 }
 0x331   : > { %v1071_v1 = vmul.f32 %v1058_v63, %v1047_v62 }
 0x333   : > { %1075 = vst.msk [vmem:[%s270_s28 + $0x8] sm:$0xff] %vm284_vm0, %v1071_v1 }
 0x334   : > { %v1063_v2 = vpop.permute.xlu1 %1062 }
 0x335   : > { %v1072_v4 = vmul.f32 %v1063_v2, %v1048_v3 }
 0x337   : > { %1076 = vst.msk [vmem:[%s270_s28 + $0x10] sm:$0xff] %vm284_vm0, %v1072_v4 }
 0x338   : > { %v1068_v5 = vpop.permute.xlu0 %1067 }
 0x339   : > { %v1073_v6 = vmul.f32 %v1068_v5, %v1049_v0 }
 0x33b   : > { %1077 = vst.msk [vmem:[%s270_s28 + $0x18] sm:$0xff] %vm284_vm0, %v1073_v6 }
 0x33c PF: > { %s13_s14 = sadd.s32 1, %s1363_s14   ;;  %s1542_s12 = smov %s1359_s13 }
 0x33d   : > { %p10_p5 = scmp.ge.s32.totalorder %s13_s14, 4   ;;  %s1543_s13 = smov %s1545_s15 }
 0x33f   :  { %12 = sbr.rel (!%p10_p5) target bundleno = 2 (0x2), region = 76 }

// kernel: transformer_lm_layer.5
= control target key start
LH: loop header
LB: loop body
LE: loop exit
PB: predicated region body
PF: predicated region fallthrough
CT: control target
= control target key end

     0   :  { %13 = vsyncpa [#allocation6], 0  ;;  %s1275_s0 = inlined_call_operand.vmem [shape: f32[2,8,32], index: 0, kind: input, shape index: {}]   ;;  %s1276_s1 = inlined_call_operand.vmem [shape: f32[2,4,8,8], index: 1, kind: input, shape index: {}]   ;;  %s1277_s2 = inlined_call_operand.vmem [shape: f32[1,32], index: 2, kind: input, shape index: {}]   ;;  %s1278_s3 = inlined_call_operand.vmem [shape: f32[1,32], index: 3, kind: input, shape index: {}]   ;;  %s1279_s4 = inlined_call_operand.vmem [shape: f32[32,64], index: 4, kind: input, shape index: {}]   ;;  %s1280_s5 = inlined_call_operand.vmem [shape: f32[1,64], index: 5, kind: input, shape index: {}]   ;;  %s1281_s6 = inlined_call_operand.vmem [shape: f32[64,32], index: 6, kind: input, shape index: {}]   ;;  %s1282_s7 = inlined_call_operand.vmem [shape: f32[1,32], index: 7, kind: input, shape index: {}]   ;;  %s1283_s8 = inlined_call_operand.hbm [shape: f32[2,8,32], index: 8, kind: output, shape index: {}]  }
   0x1   :  { %15 = vsyncpa [#allocation6 + $0x1], 0  ;;  %s1104_s27 = smov 0   ;;  %s1106_s28 = smov 0  }
   0x2   :  { %s1108_s29 = smov 0   ;;  %s1110_s30 = smov 0  }
   0x3   :  { %s1112_s9 = smov 0   ;;  %s1114_s10 = smov 0  }
   0x4 LB: > { %s821_s11 = sadd.s32 4294967295, %s1050_s10   ;;  %s822_s12 = sadd.s32 4294967294, %s1050_s10   ;;  %s1050_s10 = sphi %s1114_s10, %s21_s10   ;;  %s1046_s9 = sphi %s1112_s9, %s1290_s9   ;;  %s1042_s30 = sphi %s1110_s30, %s1289_s30   ;;  %s1038_s29 = sphi %s1108_s29, %s1288_s29   ;;  %s1034_s28 = sphi %s1106_s28, %s1287_s28   ;;  %s1030_s27 = sphi %s1104_s27, %s1286_s27  }
   0x5   : > { %s40_s13 = sadd.s32 1, %s1046_s9  ;;  %s246_s14 = sadd.s32 1, %s1038_s29 }
   0x6   : > { %p42_p0 = scmp.ge.s32.totalorder %s40_s13, 2  ;;  %p256_p1 = scmp.ne.s32.totalorder %s1038_s29, %s1034_s28 }
   0x7   : > { %p257_p2 = scmp.eq.s32.totalorder %s821_s11, 1  ;;  %p262_p3 = scmp.ne.s32.totalorder %s1034_s28, %s1030_s27 }
   0x8   : > { %s1292_s13 = smov (%p42_p0, %s40_s13), 0  ;;  %p263_p5 = scmp.eq.s32.totalorder %s822_s12, 1 }
   0x9   : > { %p1144_p4 = por %p257_p2, %p256_p1  ;;  %s241_s16 = ssub.s32 %s1046_s9, %s1292_s13 }
   0xa   : > { %p828_p6 = scmp.ge.s32.totalorder %s1050_s10, 1  ;;  %p244_p7 = scmp.eq.s32.totalorder %s241_s16, 0 }
   0xb   : > { %p1151_p8 = por %p263_p5, %p262_p3  ;;  %p333_p9 = scmp.lt.s32.totalorder %s1050_s10, 3 }
   0xc   : > { %s1157_s18 = scalar_select %p244_p7, %s1038_s29, %s246_s14  }
   0xd   : > { %p334_p10 = pnand %p828_p6, %p333_p9 }
   0xe   : > { %p389_p11 = scmp.lt.s32.totalorder (!%p334_p10), %s1042_s30, 1  ;;  %vm423_vm0 = vcmask (!%p334_p10), 64512   ;;  %s1052_s24 = smov (!%p334_p10), 8   ;;  %vm431_vm1 = vcmask (!%p334_p10), 130112   ;;  %vm439_vm2 = vcmask (!%p334_p10), 195712   ;;  %vm447_vm3 = vcmask (!%p334_p10), 261312  }
   0xf   : > { %337 = sbr.rel (%p334_p10) target bundleno = 934 (0x3a6), region = 52  ;;  %s1053_s25 = smov (!%p334_p10), 24   ;;  %vm451_vm4 = vcmask (!%p334_p10), 261120   ;;  %v486_v16 = vld [vmem:[%s1279_s4] sm:$0xff] (!%p334_p10)  ;;  %v487_v17 = vld [vmem:[%s1279_s4 + $0x8] sm:$0xff] (!%p334_p10)  ;;  %v1055_v19 = vmov (!%p334_p10), 0.0|0.0  }
  0x10   : > { %s1054_s26 = smov (!%p334_p10), 16   ;;  %v892_v18 = vpack.c.bf16 (!%p334_p10), %v487_v17, %v486_v16  ;;  %891 = vmatprep.subr.bf16.mxu0 (!%p334_p10), %v1055_v19  ;;  %v488_v20 = vld [vmem:[%s1279_s4 + $0x10] sm:$0xff] (!%p334_p10)  ;;  %v489_v21 = vld [vmem:[%s1279_s4 + $0x18] sm:$0xff] (!%p334_p10)  ;;  %897 = vmatprep.subr.bf16.mxu1 (!%p334_p10), %v1055_v19  ;;  %v1056_v23 = vmov (!%p334_p10), 0.0   ;;  %vm1057_vm5 = vmmov (!%p334_p10), 0   ;;  %v573_v24 = vld [vmem:[%s1281_s6] sm:$0xff] (!%p334_p10) }
  0x11   : > { %v895_v22 = vpack.c.bf16 (!%p334_p10), %v489_v21, %v488_v20  ;;  %484 = vst.msk [vmem:[#allocation4] sm:$0xff] (!%p334_p10), %vm451_vm4, %v1056_v23  ;;  %869 = vmatprep.mubr.msk.f32.mxu0 (!%p334_p10), %vm1057_vm5, %v1056_v23  ;;  %888 = vmatprep.mubr.msk.f32.mxu1 (!%p334_p10), %vm1057_vm5, %v1056_v23  ;;  %v574_v25 = vld [vmem:[%s1281_s6 + $0x8] sm:$0xff] (!%p334_p10)  ;;  %v575_v26 = vld [vmem:[%s1281_s6 + $0x10] sm:$0xff] (!%p334_p10)  ;;  %v576_v28 = vld [vmem:[%s1281_s6 + $0x18] sm:$0xff] (!%p334_p10)  ;;  %vm581_vm6 = vcmask (!%p334_p10), 523264   ;;  %s843_s14 = sshll.u32 (!%p334_p10), %s1042_s30, 7 }
  0x12   : > { %893 = vmatpush3.bf16.msra.mxu0 (!%p334_p10), %v892_v18  ;;  %v898_v27 = vpack.c.bf16 (!%p334_p10), %v574_v25, %v573_v24  ;;  %v901_v29 = vpack.c.bf16 (!%p334_p10), %v576_v28, %v575_v26  ;;  %v577_v30 = vld [vmem:[%s1281_s6 + $0x20] sm:$0xff] (!%p334_p10)  ;;  %v578_v31 = vld [vmem:[%s1281_s6 + $0x28] sm:$0xff] (!%p334_p10)  ;;  %v579_v43 = vld [vmem:[%s1281_s6 + $0x30] sm:$0xff] (!%p334_p10)  ;;  %s1227_s22 = scalar_lea.hbm (!%p334_p10), %s1283_s8, %s843_s14 }
  0x13   : > { %894 = vmatprep.subr.bf16.mxu0 (!%p334_p10), %v1055_v19  ;;  %v904_v32 = vpack.c.bf16 (!%p334_p10), %v578_v31, %v577_v30  ;;  %v836_v37 = vld [vmem:[%s1277_s2] ss:$0 sm:$0xff] (!%p334_p10)  ;;  %v580_v44 = vld [vmem:[%s1281_s6 + $0x38] sm:$0xff] (!%p334_p10) }
  0x14   : > { %899 = vmatpush3.bf16.msra.mxu1 (!%p334_p10), %v898_v27  ;;  %v837_v39 = vld [vmem:[%s1278_s3] ss:$0 sm:$0xff] (!%p334_p10)  ;;  %v907_v45 = vpack.c.bf16 (!%p334_p10), %v580_v44, %v579_v43 }
  0x15   : > { %900 = vmatprep.subr.bf16.mxu1 (!%p334_p10), %v1055_v19  ;;  %v838_v46 = vld [vmem:[%s1280_s5] ss:$0 sm:$0xff] (!%p334_p10) }
  0x16   : > { %s390_s19 = scalar_select %p389_p11, %s1042_s30, 1  ;;  %896 = vmatpush3.bf16.msra.mxu0 %v895_v22  ;;  %v841_v55 = vld [vmem:[%s1282_s7] ss:$0 sm:$0xff] }
  0x17   : > { %s1058_s30 = smov [#allocation5]  }
  0x18   : > { %s846_s20 = sshll.u32 %s390_s19, 5  ;;  %s830_s11 = sshll.u32 %s390_s19, 3  ;;  %902 = vmatpush3.bf16.msra.mxu1 %v901_v29  ;;  %v572_v51 = vld [vmem:[#allocation4] sm:$0xff] }
  0x19   : > { %s403_s23 = scalar_lea.vmem %s1276_s1, %s846_s20  ;;  %s395_s16 = scalar_lea.vmem %s1275_s0, %s830_s11  ;;  %903 = vmatprep.subr.bf16.mxu1 %v1055_v19 }
  0x1a   : > { %v833_v0 = vld [vmem:[%s403_s23 + $0x8] sm:$0xff]  ;;  %v835_v1 = vld [vmem:[%s403_s23 + $0x18] sm:$0xff]  ;;  %v422_v2 = vld [vmem:[%s403_s23] sm:$0xff] }
  0x1b   : > { %428 = vrot.lane.b32.xlu0 %v833_v0, %s1052_s24  ;;  %444 = vrot.lane.b32.xlu1 %v835_v1, %s1053_s25  ;;  %v834_v3 = vld [vmem:[%s403_s23 + $0x10] sm:$0xff]  ;;  %424 = vst.msk [vmem:[#allocation2] sm:$0xff] %vm423_vm0, %v422_v2  ;;  %v421_v7 = vld [vmem:[%s395_s16] sm:$0xff]  ;;  %s386_s25 = sand.u32 1, %s1034_s28  }
  0x1c   : > { %905 = vmatpush3.bf16.msra.mxu1 %v904_v32  ;;  %s673_s23 = scalar_lea.sflag [#allocation6], %s386_s25 }
  0x1d   : > { %906 = vmatprep.subr.bf16.mxu1 %v1055_v19 }
  0x1f   : > { %436 = vrot.lane.b32.xlu0 %v834_v3, %s1054_s26  ;;  %s829_s26 = sshll.u32 %s386_s25, 3 }
  0x20   : > { %908 = vmatpush3.bf16.msra.mxu1 %v907_v45  ;;  %s388_s16 = scalar_lea.vmem [#allocation5], %s829_s26  ;;  %s976_s26 = sshll.u32 %s1058_s30, 4  ;;  %s977_s26 = int_to_ptr.vmem [resolvable:$false] %s976_s26 }
  0x21   : > { %s687_s19 = sshll.u32 %s388_s16, 4  ;;  %s978_s11 = scalar_lea.vmem %s977_s26, 256  ;;  %s1229_s19 = int_to_ptr.vmem [resolvable:$true] %s687_s19 }
  0x22   : > { %s972_s24 = scalar_lea.vmem %s1229_s19, 128  ;;  %p979_p1 = scmp.lt.s32.totalorder %s1229_s19, %s977_s26 }
  0x23   : > { %p973_p12 = scmp.ne.s32.totalorder %s1229_s19, %s972_s24  ;;  %p980_p2 = scmp.lt.s32.totalorder %s978_s11, %s972_s24 }
  0x25   : > { %p974_p13 = pnand %p973_p12, %p1144_p4  ;;  %p981_p3 = por %p980_p2, %p979_p1 }
  0x27   : > { %p975_p0 = pneg %p974_p13 }
  0x29   : > { %p982_p5 = pnand %p981_p3, %p975_p0 }
  0x8d   : > { %v429_v4 = vpop.permute.xlu0 %428  ;;  %v445_v5 = vpop.permute.xlu1 %444 }
  0x8e   : > { %432 = vst.msk [vmem:[#allocation2] sm:$0xff] %vm431_vm1, %v429_v4 }
  0x91   : > { %v437_v6 = vpop.permute.xlu0 %436 }
  0x92   : > { %440 = vst.msk [vmem:[#allocation2] sm:$0xff] %vm439_vm2, %v437_v6 }
  0x93   : > { %448 = vst.msk [vmem:[#allocation2] sm:$0xff] %vm447_vm3, %v445_v5 }
  0x9a   : > { %v449_v8 = vld [vmem:[#allocation2] sm:$0xff] }
  0x9b   : > { %v450_v9 = vadd.f32 %v449_v8, %v421_v7 }
  0x9d   : > { %v455_v10 = vsel %vm451_vm4, %v450_v9, 0.0  ;;  %452 = vst.msk [vmem:[#allocation2] sm:$0xff] %vm451_vm4, %v450_v9 }
  0x9e   : > { %456 = vadd.xlane.f32.xlu1 %v455_v10 }
  0xa4   : > { %v669_v58 = vld [vmem:[#allocation2] sm:$0xff] }
 0x12b   : > { %v457_v11 = vpop.xlane.xlu1 %456 }
 0x12c   : > { %v459_v12 = vmul.f32 0.03125, %v457_v11 }
 0x12e   : > { %v460_v13 = vsub.f32 %v450_v9, %v459_v12 }
 0x130   : > { %v461_v14 = vmul.f32 %v460_v13, %v460_v13 }
 0x132   : > { %v462_v15 = vsel %vm451_vm4, %v461_v14, 0.0 }
 0x133   : > { %463 = vadd.xlane.f32.xlu0 %v462_v15 }
 0x1c0   : > { %v464_v33 = vpop.xlane.xlu0 %463 }
 0x1c1   : > { %v465_v34 = vmul.f32 0.03125, %v464_v33 }
 0x1c3   : > { %v466_v35 = vadd.f32 1e-05, %v465_v34 }
 0x1c5   : > { %970 = vrsqrt.f32 %v466_v35 }
 0x1cf   : > { %v971_v36 = vpop.eup %970 }
 0x1d0   : > { %v468_v38 = vmul.f32 %v971_v36, %v460_v13 }
 0x1d2   : > { %v475_v40 = vmul.f32 %v836_v37, %v468_v38 }
 0x1d4   : > { %v482_v41 = vadd.f32 %v837_v39, %v475_v40 }
 0x1d6   : > { %483 = vst.msk [vmem:[#allocation3] sm:$0xff] %vm451_vm4, %v482_v41 }
 0x1dd   : > { %v485_v42 = vld [vmem:[#allocation3] sm:$0xff] }
 0x1de   : > { %870 = vmatmul.mubr.msk.f32.vlgmr.msra.gmra.mrb[0].mxu0 %vm451_vm4, %v485_v42 }
 0x2b1   : > { %v567_v47 = vpop.f32.mrb[0].mxu0 }
 0x2b2   : > { %v568_v48 = vadd.f32 %v838_v46, %v567_v47  ;;  %v871_v49 = vpop.f32.mrb[1].mxu0 }
 0x2b4   : > { %v571_v50 = vmax.f32 %v568_v48, 0.0 }
 0x2b6   : > { %889 = vmatmul.mubr.msk.f32.vlgmr.msra.gmra.mrb[0].mxu1 %vm581_vm6, %v571_v50 }
 0x389   : > { %v651_v52 = vpop.f32.mrb[0].mxu1 }
 0x38a   : > { %v655_v53 = vadd.f32 %v651_v52, %v572_v51  ;;  %v890_v54 = vpop.f32.mrb[1].mxu1 }
 0x38c   : > { %656 = vst.msk [vmem:[#allocation4] sm:$0xff] %vm451_vm4, %v655_v53 }
 0x393   : > { %v660_v56 = vld [vmem:[#allocation4] sm:$0xff] }
 0x394   : > { %v668_v57 = vadd.f32 %v841_v55, %v660_v56 }
 0x396   : > { %v670_v59 = vadd.f32 %v669_v58, %v668_v57 }
 0x398   : > { %671 = vst.msk [vmem:[%s388_s16] sm:$0xff] %vm451_vm4, %v670_v59 }
 0x399   : > { %985 = shalt.err (!%p982_p5)
}
 0x39a   : > { %s986_s25 = scalar_lea.hbm %s1227_s22, 128  ;;  %s990_s16 = scalar_lea.hbm %s1283_s8, 256 }
 0x39b   : > { %p987_p6 = scmp.ne.s32.totalorder %s1227_s22, %s986_s25  ;;  %p991_p10 = scmp.lt.u32.totalorder %s1227_s22, %s1283_s8 }
 0x39c   : > { %p992_p11 = scmp.lt.u32.totalorder %s990_s16, %s986_s25  ;;  %p994_p13 = scmp.lt.u32.totalorder %s986_s25, %s1227_s22 }
 0x39d   : > { %p988_p7 = pnand %p987_p6, %p1144_p4 }
 0x39e   : > { %p993_p12 = por %p992_p11, %p991_p10 }
 0x39f   : > { %p989_p9 = pneg %p988_p7 }
 0x3a0   : > { %p995_p0 = por %p994_p13, %p993_p12 }
 0x3a2   : > { %p996_p1 = pnand %p995_p0, %p989_p9 }
 0x3a4   : > { %999 = shalt.err (!%p996_p1)
}
 0x3a5   : > { %909 = dma.vmem_to_hbm [thread:$0]  (%p1144_p4), %s1229_s19, 128, %s1227_s22, %s673_s23  }
 0x3a6 PF: > { %p915_p2 = scmp.ge.s32.totalorder %s1050_s10, 2  ;;  %s699_s24 = sand.u32 1, %s1030_s27  }
 0x3a7   : > { %s700_s30 = scalar_lea.sflag [#allocation6], %s699_s24 }
 0x3a8   : > { %p912_p3 = pnand %p915_p2, %p1151_p8 }
 0x3aa   : > { %1025 = dma.done.wait (!%p912_p3), %s700_s30, 128  }
 0x3ab   : > { %1027 = vsyncadd (!%p912_p3), %s700_s30, 4294967168  ;;  %s21_s10 = sadd.s32 1, %s1050_s10   ;;  %s1286_s27 = smov %s1034_s28 }
 0x3ac   : > { %p18_p5 = scmp.ge.s32.totalorder %s21_s10, 4   ;;  %s1287_s28 = smov %s1038_s29 }
 0x3ad   : > { %s1288_s29 = smov %s1157_s18  ;;  %s1289_s30 = smov %s1046_s9 }
 0x3ae   : > { %s1290_s9 = smov %s1292_s13  ;;  %20 = sbr.rel (!%p18_p5) target bundleno = 4 (0x4), region = 110 }
 0x3b5   :  { %705 = vsyncpa [#allocation6], 1 }
 0x3b6   :  { %707 = vsyncpa [#allocation6 + $0x1], 1 }

</bundles_post_ra>
